<compile_context>
chip_gen: v7x
topology: tpu7x:2x2x1
jax: 0.10.0
libtpu: 0.0.40
codegen_flags: <defaults>
</compile_context>

<pallas_src>
import functools

import jax
import jax.numpy as jnp
from jax.experimental import pallas as pl
from jax.experimental.pallas import tpu as pltpu


# ----------------------------------------------------------------------------
# Fused kernel: (LSTM1 step t -> dropout2d -> LSTM2 step t) x T -> linear -> softmax
# ----------------------------------------------------------------------------
def _fused_forward_kernel(x_ref, wih1_ref, whh1_ref, b1_ref,
                          wih2_ref, whh2_ref, b2_ref,
                          wlin_ref, blin_ref,
                          h01_ref, c01_ref, h02_ref, c02_ref,
                          *drop_and_out, T, Bb, H1, H2, has_dropout):
    """Per-grid-program shapes (batch block Bb, gate order [i, f, g, o]):

    x_ref:    (1, T*Bb, D)  time-major rows: row t*Bb + b
    wih1_ref: (D, 4H1)      whh1_ref: (H1, 4H1)  b1_ref: (1, 4H1)  (b_ih+b_hh)
    wih2_ref: (H1, 4H2)     whh2_ref: (H2, 4H2)  b2_ref: (1, 4H2)
      (g-gate columns of all w_ih/w_hh/bias are pre-scaled by 2 so that
       tanh(g) == 2*sigmoid(2g) - 1 comes out of the single sigmoid slab)
    wlin_ref: (H2, 4)       blin_ref: (1, 4)
    h01/c01:  (Bb, H1)      h02/c02:  (Bb, H2)
    drop1_ref:(T, Bb, 1)    dropout2d multipliers for lstm1 output (per (t,b))
    drop2_ref:(Bb, 1)       dropout2d multiplier for lstm2's last time step
    o_ref:    (Bb, 4)       softmax scores
    """
    if has_dropout:
        drop1_ref, drop2_ref, o_ref = drop_and_out
    else:
        (o_ref,) = drop_and_out
        drop1_ref = drop2_ref = None

    # ---- layer-1 input projection hoisted out of the recurrence -------------
    # One (T*Bb, D) @ (D, 4H1) MXU matmul, bias folded; per-step gates are then
    # contiguous leading-dim slices (no per-step strided gather).
    x_tm = x_ref[0]                                           # (T*Bb, D)
    g1_all = (jnp.dot(x_tm, wih1_ref[...],
                      preferred_element_type=jnp.float32) + b1_ref[...])

    whh1 = whh1_ref[...]
    wih2 = wih2_ref[...]
    whh2 = whh2_ref[...]
    b2 = b2_ref[...]

    h1 = h01_ref[...]
    c1 = c01_ref[...]
    h2 = h02_ref[...]
    c2 = c02_ref[...]

    # Statically unrolled fused recurrence.  Layer-2 step t depends only on
    # h1_t; layer-1 step t+1 and layer-2 step t are independent chains inside
    # the single unrolled basic block, so the scheduler interleaves them.
    for t in range(T):
        # ---------------- layer-1 step t ----------------
        g = g1_all[t * Bb:(t + 1) * Bb, :] + jnp.dot(
            h1, whh1, preferred_element_type=jnp.float32)
        s = jax.nn.sigmoid(g)                                 # one EUP slab
        i = s[:, 0 * H1:1 * H1]
        f = s[:, 1 * H1:2 * H1]
        gc = 2.0 * s[:, 2 * H1:3 * H1] - 1.0                  # == tanh(g_orig)
        o = s[:, 3 * H1:4 * H1]
        c1 = f * c1 + i * gc
        h1 = o * jnp.tanh(c1)

        h1d = h1
        if has_dropout:
            # dropout2d: zero whole (b, t) channels of the lstm1 output.
            h1d = h1 * drop1_ref[t]                           # (Bb, 1) bcast

        # ---------------- layer-2 step t ----------------
        g = (jnp.dot(h1d, wih2, preferred_element_type=jnp.float32) + b2
             + jnp.dot(h2, whh2, preferred_element_type=jnp.float32))
        s = jax.nn.sigmoid(g)
        i = s[:, 0 * H2:1 * H2]
        f = s[:, 1 * H2:2 * H2]
        gc = 2.0 * s[:, 2 * H2:3 * H2] - 1.0
        o = s[:, 3 * H2:4 * H2]
        c2 = f * c2 + i * gc
        h2 = o * jnp.tanh(c2)

    # second dropout2d only affects the last time step that we consume
    if has_dropout:
        h2 = h2 * drop2_ref[...]

    # ---- linear head + softmax (approx reciprocal -> EUP slot) --------------
    logits = (jnp.dot(h2, wlin_ref[...],
                      preferred_element_type=jnp.float32) + blin_ref[...])
    m = jnp.max(logits, axis=1, keepdims=True)
    e = jnp.exp(logits - m)
    inv = pl.reciprocal(jnp.sum(e, axis=1, keepdims=True), approx=True)
    o_ref[...] = (e * inv).astype(o_ref.dtype)


# ----------------------------------------------------------------------------
# Wrapper
# ----------------------------------------------------------------------------
def lstm_ensemble_forward(x_btd, packed_params, drop1=None, drop2=None, *,
                          batch_block=None):
    """x_btd: (B, T, D) float32.  packed_params: pre-transposed/pre-scaled.
    drop1: (T, B, 1) or None, drop2: (B, 1) or None dropout2d multipliers
    (None == drop_mask 0.0: the dropout path is skipped at trace time)."""
    (wih1_t, whh1_t, b1, wih2_t, whh2_t, b2, wlin_t, blin,
     h01, c01, h02, c02) = packed_params
    B, T, D = x_btd.shape
    H1 = whh1_t.shape[0]
    H2 = whh2_t.shape[0]

    assert (drop1 is None) == (drop2 is None)
    has_dropout = drop1 is not None

    if batch_block is None:
        batch_block = min(B, 8)
    Bb = batch_block
    assert B % Bb == 0
    nb = B // Bb                                   # grid over batch blocks

    # Time-major, batch-block-major input: block j holds rows t*Bb + b for
    # batch indices j*Bb..(j+1)*Bb-1.  Rearrangement is outside the kernel.
    x_blk = jnp.transpose(x_btd, (1, 0, 2))                    # (T, B, D)
    x_blk = x_blk.reshape(T, nb, Bb, D)
    x_blk = jnp.transpose(x_blk, (1, 0, 2, 3)).reshape(nb, T * Bb, D)

    in_specs = [
        pl.BlockSpec((1, T * Bb, D), lambda j: (j, 0, 0)),     # x (time-major)
        pl.BlockSpec((D, 4 * H1), lambda j: (0, 0)),           # wih1
        pl.BlockSpec((H1, 4 * H1), lambda j: (0, 0)),          # whh1
        pl.BlockSpec((1, 4 * H1), lambda j: (0, 0)),           # b1
        pl.BlockSpec((H1, 4 * H2), lambda j: (0, 0)),          # wih2
        pl.BlockSpec((H2, 4 * H2), lambda j: (0, 0)),          # whh2
        pl.BlockSpec((1, 4 * H2), lambda j: (0, 0)),           # b2
        pl.BlockSpec((H2, 4), lambda j: (0, 0)),               # wlin
        pl.BlockSpec((1, 4), lambda j: (0, 0)),                # blin
        pl.BlockSpec((Bb, H1), lambda j: (j, 0)),              # h01
        pl.BlockSpec((Bb, H1), lambda j: (j, 0)),              # c01
        pl.BlockSpec((Bb, H2), lambda j: (j, 0)),              # h02
        pl.BlockSpec((Bb, H2), lambda j: (j, 0)),              # c02
    ]
    args = [x_blk, wih1_t, whh1_t, b1, wih2_t, whh2_t, b2, wlin_t, blin,
            h01, c01, h02, c02]
    if has_dropout:
        in_specs += [pl.BlockSpec((T, Bb, 1), lambda j: (0, j, 0)),   # drop1
                     pl.BlockSpec((Bb, 1), lambda j: (j, 0))]         # drop2
        args += [drop1, drop2]

    kernel = functools.partial(_fused_forward_kernel, T=T, Bb=Bb,
                               H1=H1, H2=H2, has_dropout=has_dropout)
    return pl.pallas_call(
        kernel,
        out_shape=jax.ShapeDtypeStruct((B, 4), jnp.float32),
        grid=(nb,),
        in_specs=in_specs,
        out_specs=pl.BlockSpec((Bb, 4), lambda j: (j, 0)),
        compiler_params=pltpu.CompilerParams(
            dimension_semantics=("parallel",)),    # 2nd TensorCore on v7x
    )(*args)


# ----------------------------------------------------------------------------
# Parameter construction (PyTorch layouts) + one-time packing (kernel layouts)
# ----------------------------------------------------------------------------
def make_lstm_params(key, inp_dim, hidden_dim):
    k = 1.0 / jnp.sqrt(jnp.float32(hidden_dim))
    ks = jax.random.split(key, 4)
    w_ih = jax.random.uniform(ks[0], (4 * hidden_dim, inp_dim), jnp.float32, -k, k)
    w_hh = jax.random.uniform(ks[1], (4 * hidden_dim, hidden_dim), jnp.float32, -k, k)
    b_ih = jax.random.uniform(ks[2], (4 * hidden_dim,), jnp.float32, -k, k)
    b_hh = jax.random.uniform(ks[3], (4 * hidden_dim,), jnp.float32, -k, k)
    return w_ih, w_hh, b_ih, b_hh


def make_linear_params(key, in_dim, out_dim):
    k = 1.0 / jnp.sqrt(jnp.float32(in_dim))
    k1, k2 = jax.random.split(key)
    w = jax.random.uniform(k1, (out_dim, in_dim), jnp.float32, -k, k)
    b = jax.random.uniform(k2, (out_dim,), jnp.float32, -k, k)
    return w, b


def xavier_normal_state(key, batch, hidden):
    # torch.nn.init.xavier_normal_ on a (1, B, H) tensor.
    std = jnp.sqrt(2.0 / (batch * hidden + hidden))
    return std * jax.random.normal(key, (batch, hidden), jnp.float32)


def _g_gate_scale(hidden):
    """Columns [2H:3H] (the cell gate) scaled by 2 so the kernel can recover
    tanh(g) from the full-width sigmoid slab as 2*sigmoid(2g) - 1."""
    return jnp.ones((1, 4 * hidden), jnp.float32).at[:, 2 * hidden:3 * hidden].set(2.0)


def pack_params(raw_params):
    """One-time transpose/combine/pre-scale into kernel layout."""
    (w_ih1, w_hh1, b_ih1, b_hh1,
     w_ih2, w_hh2, b_ih2, b_hh2,
     w_lin, b_lin, h01, c01, h02, c02) = raw_params
    H1 = w_hh1.shape[1]
    H2 = w_hh2.shape[1]
    s1 = _g_gate_scale(H1)
    s2 = _g_gate_scale(H2)
    return (jnp.transpose(w_ih1) * s1, jnp.transpose(w_hh1) * s1,
            (b_ih1 + b_hh1).reshape(1, 4 * H1) * s1,
            jnp.transpose(w_ih2) * s2, jnp.transpose(w_hh2) * s2,
            (b_ih2 + b_hh2).reshape(1, 4 * H2) * s2,
            jnp.transpose(w_lin), b_lin.reshape(1, -1),
            h01, c01, h02, c02)


def make_dropout_multipliers(key, p, B, T):
    """PyTorch F.dropout2d on a (B, T, H) tensor zeros whole channels (dim 1)
    with prob p and rescales by 1/(1-p).  Returns per-(t,b) multipliers for the
    lstm1 output and the per-b multiplier for the last time step of lstm2.
    TODO(synk): torch's exact RNG stream is not reproducible in JAX; these are
    jax.random-built multipliers with the same distribution/semantics."""
    if p <= 0.0:
        return None, None
    k1, k2 = jax.random.split(key)
    scale = 1.0 / (1.0 - p)
    keep1 = jax.random.bernoulli(k1, 1.0 - p, (B, T)).astype(jnp.float32)
    keep2 = jax.random.bernoulli(k2, 1.0 - p, (B, T)).astype(jnp.float32)
    m1 = (keep1 * scale).T.reshape(T, B, 1)
    m2 = (keep2[:, T - 1] * scale).reshape(B, 1)
    return m1, m2


# ----------------------------------------------------------------------------
# Pure-JAX reference (for correctness check only)
# ----------------------------------------------------------------------------
def _lstm_ref(x_btd, w_ih, w_hh, b_ih, b_hh, h0, c0):
    H = w_hh.shape[1]

    def step(carry, x_t):
        h, c = carry
        gates = x_t @ w_ih.T + h @ w_hh.T + b_ih + b_hh
        i = jax.nn.sigmoid(gates[:, :H])
        f = jax.nn.sigmoid(gates[:, H:2 * H])
        g = jnp.tanh(gates[:, 2 * H:3 * H])
        o = jax.nn.sigmoid(gates[:, 3 * H:])
        c = f * c + i * g
        h = o * jnp.tanh(c)
        return (h, c), h

    xs = jnp.transpose(x_btd, (1, 0, 2))
    _, hs = jax.lax.scan(step, (h0, c0), xs)
    return jnp.transpose(hs, (1, 0, 2))             # (B, T, H)


def model_ref(x, raw_params, drop1, drop2):
    (w_ih1, w_hh1, b_ih1, b_hh1, w_ih2, w_hh2, b_ih2, b_hh2,
     w_lin, b_lin, h01, c01, h02, c02) = raw_params
    out1 = _lstm_ref(x, w_ih1, w_hh1, b_ih1, b_hh1, h01, c01)
    out1 = out1 * jnp.transpose(drop1, (1, 0, 2))   # (B, T, 1) multipliers
    out2 = _lstm_ref(out1, w_ih2, w_hh2, b_ih2, b_hh2, h02, c02)
    last = out2[:, -1, :] * drop2
    logits = last @ w_lin.T + b_lin
    return jax.nn.softmax(logits, axis=1)


# ----------------------------------------------------------------------------
if __name__ == "__main__":
    # Small shapes consistent with the module's forward pass.  batch=16 with
    # batch_block=8 fills matmul sublanes per program and gives a 2-wide
    # parallel grid (both TensorCores on v7x).
    batch, seq, inp_dim, hidden1, hidden2 = 16, 8, 8, 32, 16

    root = jax.random.PRNGKey(0)
    (k_x, k_l1, k_l2, k_lin, k_h1, k_c1, k_h2, k_c2, k_drop) = \
        jax.random.split(root, 9)

    x = jax.random.normal(k_x, (batch, seq, inp_dim), jnp.float32)

    w_ih1, w_hh1, b_ih1, b_hh1 = make_lstm_params(k_l1, inp_dim, hidden1)
    w_ih2, w_hh2, b_ih2, b_hh2 = make_lstm_params(k_l2, hidden1, hidden2)
    w_lin, b_lin = make_linear_params(k_lin, hidden2, 4)

    # init_hidden(): xavier-normal initial (h, c) for each LSTM layer.
    h01 = xavier_normal_state(k_h1, batch, hidden1)
    c01 = xavier_normal_state(k_c1, batch, hidden1)
    h02 = xavier_normal_state(k_h2, batch, hidden2)
    c02 = xavier_normal_state(k_c2, batch, hidden2)

    raw_params = (w_ih1, w_hh1, b_ih1, b_hh1,
                  w_ih2, w_hh2, b_ih2, b_hh2,
                  w_lin, b_lin, h01, c01, h02, c02)
    packed = pack_params(raw_params)                # one-time transpose/scale

    # Tolerance is 5e-3: the only approximations vs the f32 reference are the
    # EUP approx reciprocal in the softmax and last-ulp tanh==2*sigmoid(2x)-1.
    TOL = 5e-3

    # ---- deterministic path (drop_mask = 0.0): dropout skipped at trace time
    out0 = jax.block_until_ready(lstm_ensemble_forward(x, packed, batch_block=8))
    assert out0.shape == (batch, 4)
    assert bool(jnp.all(jnp.abs(jnp.sum(out0, axis=1) - 1.0) < TOL))
    ones1 = jnp.ones((seq, batch, 1), jnp.float32)
    ones2 = jnp.ones((batch, 1), jnp.float32)
    ref0 = model_ref(x, raw_params, ones1, ones2)
    assert bool(jnp.max(jnp.abs(out0 - ref0)) < TOL)

    # ---- dropout path (drop_mask = 0.25): multipliers are host-built and
    # deterministic given the key, so the reference uses the same ones.
    drop1, drop2 = make_dropout_multipliers(k_drop, 0.25, batch, seq)
    out1 = jax.block_until_ready(
        lstm_ensemble_forward(x, packed, drop1, drop2, batch_block=8))
    ref1 = model_ref(x, raw_params, drop1, drop2)
    assert bool(jnp.max(jnp.abs(out1 - ref1)) < TOL)

    print("KERNEL_OK")
</pallas_src>

<mosaic_0001>
module attributes {stable_mosaic.version = 11 : i64} {
  func.func @_fused_forward_kernel(%arg0: i32, %arg1: memref<1x64x8xf32, #tpu.memory_space<vmem>>, %arg2: memref<8x128xf32, #tpu.memory_space<vmem>>, %arg3: memref<32x128xf32, #tpu.memory_space<vmem>>, %arg4: memref<1x128xf32, #tpu.memory_space<vmem>>, %arg5: memref<32x64xf32, #tpu.memory_space<vmem>>, %arg6: memref<16x64xf32, #tpu.memory_space<vmem>>, %arg7: memref<1x64xf32, #tpu.memory_space<vmem>>, %arg8: memref<16x4xf32, #tpu.memory_space<vmem>>, %arg9: memref<1x4xf32, #tpu.memory_space<vmem>>, %arg10: memref<8x32xf32, #tpu.memory_space<vmem>>, %arg11: memref<8x32xf32, #tpu.memory_space<vmem>>, %arg12: memref<8x16xf32, #tpu.memory_space<vmem>>, %arg13: memref<8x16xf32, #tpu.memory_space<vmem>>, %arg14: memref<8x4xf32, #tpu.memory_space<vmem>>) attributes {dimension_semantics = [#tpu.dimension_semantics<parallel>], iteration_bounds = array<i64: 2>, scalar_prefetch = 0 : i64, scratch_operands = 0 : i64, tpu.core_type = #tpu.core_type<tc>, window_params = [{transform_indices = @transform_0, window_bounds = array<i64: 1, 64, 8>}, {pipeline_mode = #tpu.pipeline_mode<synchronous>, transform_indices = @transform_1, window_bounds = array<i64: 8, 128>}, {pipeline_mode = #tpu.pipeline_mode<synchronous>, transform_indices = @transform_2, window_bounds = array<i64: 32, 128>}, {pipeline_mode = #tpu.pipeline_mode<synchronous>, transform_indices = @transform_3, window_bounds = array<i64: 1, 128>}, {pipeline_mode = #tpu.pipeline_mode<synchronous>, transform_indices = @transform_4, window_bounds = array<i64: 32, 64>}, {pipeline_mode = #tpu.pipeline_mode<synchronous>, transform_indices = @transform_5, window_bounds = array<i64: 16, 64>}, {pipeline_mode = #tpu.pipeline_mode<synchronous>, transform_indices = @transform_6, window_bounds = array<i64: 1, 64>}, {pipeline_mode = #tpu.pipeline_mode<synchronous>, transform_indices = @transform_7, window_bounds = array<i64: 16, 4>}, {pipeline_mode = #tpu.pipeline_mode<synchronous>, transform_indices = @transform_8, window_bounds = array<i64: 1, 4>}, {transform_indices = @transform_9, window_bounds = array<i64: 8, 32>}, {transform_indices = @transform_10, window_bounds = array<i64: 8, 32>}, {transform_indices = @transform_11, window_bounds = array<i64: 8, 16>}, {transform_indices = @transform_12, window_bounds = array<i64: 8, 16>}, {transform_indices = @transform_13, window_bounds = array<i64: 8, 4>}]} {
    %c0 = arith.constant 0 : index
    %c0_0 = arith.constant 0 : index
    %c0_1 = arith.constant 0 : index
    %0 = vector.load %arg1[%c0, %c0_0, %c0_1] : memref<1x64x8xf32, #tpu.memory_space<vmem>>, vector<1x64x8xf32>
    %1 = vector.shape_cast %0 : vector<1x64x8xf32> to vector<64x8xf32>
    %c0_2 = arith.constant 0 : index
    %c0_3 = arith.constant 0 : index
    %2 = vector.load %arg2[%c0_2, %c0_3] : memref<8x128xf32, #tpu.memory_space<vmem>>, vector<8x128xf32>
    %cst = arith.constant dense<0.000000e+00> : vector<64x128xf32>
    %3 = tpu.matmul %1, %2, %cst {dimension_numbers = #tpu.dot_dimension_numbers<[1], [0], [0], [1], [0, 0, 1, 1], [], []>} : vector<64x8xf32>, vector<8x128xf32>, vector<64x128xf32> -> vector<64x128xf32>
    %c0_4 = arith.constant 0 : index
    %c0_5 = arith.constant 0 : index
    %4 = vector.load %arg4[%c0_4, %c0_5] : memref<1x128xf32, #tpu.memory_space<vmem>>, vector<1x128xf32>
    %5 = vector.broadcast %4 : vector<1x128xf32> to vector<64x128xf32>
    %6 = arith.addf %3, %5 : vector<64x128xf32>
    %c0_6 = arith.constant 0 : index
    %c0_7 = arith.constant 0 : index
    %7 = vector.load %arg3[%c0_6, %c0_7] : memref<32x128xf32, #tpu.memory_space<vmem>>, vector<32x128xf32>
    %c0_8 = arith.constant 0 : index
    %c0_9 = arith.constant 0 : index
    %8 = vector.load %arg5[%c0_8, %c0_9] : memref<32x64xf32, #tpu.memory_space<vmem>>, vector<32x64xf32>
    %c0_10 = arith.constant 0 : index
    %c0_11 = arith.constant 0 : index
    %9 = vector.load %arg6[%c0_10, %c0_11] : memref<16x64xf32, #tpu.memory_space<vmem>>, vector<16x64xf32>
    %c0_12 = arith.constant 0 : index
    %c0_13 = arith.constant 0 : index
    %10 = vector.load %arg7[%c0_12, %c0_13] : memref<1x64xf32, #tpu.memory_space<vmem>>, vector<1x64xf32>
    %c0_14 = arith.constant 0 : index
    %c0_15 = arith.constant 0 : index
    %11 = vector.load %arg10[%c0_14, %c0_15] : memref<8x32xf32, #tpu.memory_space<vmem>>, vector<8x32xf32>
    %c0_16 = arith.constant 0 : index
    %c0_17 = arith.constant 0 : index
    %12 = vector.load %arg11[%c0_16, %c0_17] : memref<8x32xf32, #tpu.memory_space<vmem>>, vector<8x32xf32>
    %c0_18 = arith.constant 0 : index
    %c0_19 = arith.constant 0 : index
    %13 = vector.load %arg12[%c0_18, %c0_19] : memref<8x16xf32, #tpu.memory_space<vmem>>, vector<8x16xf32>
    %c0_20 = arith.constant 0 : index
    %c0_21 = arith.constant 0 : index
    %14 = vector.load %arg13[%c0_20, %c0_21] : memref<8x16xf32, #tpu.memory_space<vmem>>, vector<8x16xf32>
    %15 = vector.extract_strided_slice %6 {offsets = [0, 0], sizes = [8, 128], strides = [1, 1]} : vector<64x128xf32> to vector<8x128xf32>
    %cst_22 = arith.constant dense<0.000000e+00> : vector<8x128xf32>
    %16 = tpu.matmul %11, %7, %cst_22 {dimension_numbers = #tpu.dot_dimension_numbers<[1], [0], [0], [1], [0, 0, 1, 1], [], []>} : vector<8x32xf32>, vector<32x128xf32>, vector<8x128xf32> -> vector<8x128xf32>
    %17 = arith.addf %15, %16 : vector<8x128xf32>
    %18 = arith.negf %17 : vector<8x128xf32>
    %19 = math.exp %18 : vector<8x128xf32>
    %cst_23 = arith.constant 1.000000e+00 : f32
    %20 = vector.broadcast %cst_23 : f32 to vector<8x128xf32>
    %21 = arith.addf %20, %19 : vector<8x128xf32>
    %22 = arith.divf %20, %21 : vector<8x128xf32>
    %23 = vector.extract_strided_slice %22 {offsets = [0, 0], sizes = [8, 32], strides = [1, 1]} : vector<8x128xf32> to vector<8x32xf32>
    %24 = vector.extract_strided_slice %22 {offsets = [0, 32], sizes = [8, 32], strides = [1, 1]} : vector<8x128xf32> to vector<8x32xf32>
    %25 = vector.extract_strided_slice %22 {offsets = [0, 64], sizes = [8, 32], strides = [1, 1]} : vector<8x128xf32> to vector<8x32xf32>
    %cst_24 = arith.constant 2.000000e+00 : f32
    %26 = vector.broadcast %cst_24 : f32 to vector<8x32xf32>
    %27 = arith.mulf %26, %25 : vector<8x32xf32>
    %cst_25 = arith.constant 1.000000e+00 : f32
    %28 = vector.broadcast %cst_25 : f32 to vector<8x32xf32>
    %29 = arith.subf %27, %28 : vector<8x32xf32>
    %30 = vector.extract_strided_slice %22 {offsets = [0, 96], sizes = [8, 32], strides = [1, 1]} : vector<8x128xf32> to vector<8x32xf32>
    %31 = arith.mulf %24, %12 : vector<8x32xf32>
    %32 = arith.mulf %23, %29 : vector<8x32xf32>
    %33 = arith.addf %31, %32 : vector<8x32xf32>
    %34 = math.tanh %33 : vector<8x32xf32>
    %35 = arith.mulf %30, %34 : vector<8x32xf32>
    %cst_26 = arith.constant dense<0.000000e+00> : vector<8x64xf32>
    %36 = tpu.matmul %35, %8, %cst_26 {dimension_numbers = #tpu.dot_dimension_numbers<[1], [0], [0], [1], [0, 0, 1, 1], [], []>} : vector<8x32xf32>, vector<32x64xf32>, vector<8x64xf32> -> vector<8x64xf32>
    %37 = vector.broadcast %10 : vector<1x64xf32> to vector<8x64xf32>
    %38 = arith.addf %36, %37 : vector<8x64xf32>
    %cst_27 = arith.constant dense<0.000000e+00> : vector<8x64xf32>
    %39 = tpu.matmul %13, %9, %cst_27 {dimension_numbers = #tpu.dot_dimension_numbers<[1], [0], [0], [1], [0, 0, 1, 1], [], []>} : vector<8x16xf32>, vector<16x64xf32>, vector<8x64xf32> -> vector<8x64xf32>
    %40 = arith.addf %38, %39 : vector<8x64xf32>
    %41 = arith.negf %40 : vector<8x64xf32>
    %42 = math.exp %41 : vector<8x64xf32>
    %cst_28 = arith.constant 1.000000e+00 : f32
    %43 = vector.broadcast %cst_28 : f32 to vector<8x64xf32>
    %44 = arith.addf %43, %42 : vector<8x64xf32>
    %45 = arith.divf %43, %44 : vector<8x64xf32>
    %46 = vector.extract_strided_slice %45 {offsets = [0, 0], sizes = [8, 16], strides = [1, 1]} : vector<8x64xf32> to vector<8x16xf32>
    %47 = vector.extract_strided_slice %45 {offsets = [0, 16], sizes = [8, 16], strides = [1, 1]} : vector<8x64xf32> to vector<8x16xf32>
    %48 = vector.extract_strided_slice %45 {offsets = [0, 32], sizes = [8, 16], strides = [1, 1]} : vector<8x64xf32> to vector<8x16xf32>
    %cst_29 = arith.constant 2.000000e+00 : f32
    %49 = vector.broadcast %cst_29 : f32 to vector<8x16xf32>
    %50 = arith.mulf %49, %48 : vector<8x16xf32>
    %cst_30 = arith.constant 1.000000e+00 : f32
    %51 = vector.broadcast %cst_30 : f32 to vector<8x16xf32>
    %52 = arith.subf %50, %51 : vector<8x16xf32>
    %53 = vector.extract_strided_slice %45 {offsets = [0, 48], sizes = [8, 16], strides = [1, 1]} : vector<8x64xf32> to vector<8x16xf32>
    %54 = arith.mulf %47, %14 : vector<8x16xf32>
    %55 = arith.mulf %46, %52 : vector<8x16xf32>
    %56 = arith.addf %54, %55 : vector<8x16xf32>
    %57 = math.tanh %56 : vector<8x16xf32>
    %58 = arith.mulf %53, %57 : vector<8x16xf32>
    %59 = vector.extract_strided_slice %6 {offsets = [8, 0], sizes = [8, 128], strides = [1, 1]} : vector<64x128xf32> to vector<8x128xf32>
    %cst_31 = arith.constant dense<0.000000e+00> : vector<8x128xf32>
    %60 = tpu.matmul %35, %7, %cst_31 {dimension_numbers = #tpu.dot_dimension_numbers<[1], [0], [0], [1], [0, 0, 1, 1], [], []>} : vector<8x32xf32>, vector<32x128xf32>, vector<8x128xf32> -> vector<8x128xf32>
    %61 = arith.addf %59, %60 : vector<8x128xf32>
    %62 = arith.negf %61 : vector<8x128xf32>
    %63 = math.exp %62 : vector<8x128xf32>
    %cst_32 = arith.constant 1.000000e+00 : f32
    %64 = vector.broadcast %cst_32 : f32 to vector<8x128xf32>
    %65 = arith.addf %64, %63 : vector<8x128xf32>
    %66 = arith.divf %64, %65 : vector<8x128xf32>
    %67 = vector.extract_strided_slice %66 {offsets = [0, 0], sizes = [8, 32], strides = [1, 1]} : vector<8x128xf32> to vector<8x32xf32>
    %68 = vector.extract_strided_slice %66 {offsets = [0, 32], sizes = [8, 32], strides = [1, 1]} : vector<8x128xf32> to vector<8x32xf32>
    %69 = vector.extract_strided_slice %66 {offsets = [0, 64], sizes = [8, 32], strides = [1, 1]} : vector<8x128xf32> to vector<8x32xf32>
    %cst_33 = arith.constant 2.000000e+00 : f32
    %70 = vector.broadcast %cst_33 : f32 to vector<8x32xf32>
    %71 = arith.mulf %70, %69 : vector<8x32xf32>
    %cst_34 = arith.constant 1.000000e+00 : f32
    %72 = vector.broadcast %cst_34 : f32 to vector<8x32xf32>
    %73 = arith.subf %71, %72 : vector<8x32xf32>
    %74 = vector.extract_strided_slice %66 {offsets = [0, 96], sizes = [8, 32], strides = [1, 1]} : vector<8x128xf32> to vector<8x32xf32>
    %75 = arith.mulf %68, %33 : vector<8x32xf32>
    %76 = arith.mulf %67, %73 : vector<8x32xf32>
    %77 = arith.addf %75, %76 : vector<8x32xf32>
    %78 = math.tanh %77 : vector<8x32xf32>
    %79 = arith.mulf %74, %78 : vector<8x32xf32>
    %cst_35 = arith.constant dense<0.000000e+00> : vector<8x64xf32>
    %80 = tpu.matmul %79, %8, %cst_35 {dimension_numbers = #tpu.dot_dimension_numbers<[1], [0], [0], [1], [0, 0, 1, 1], [], []>} : vector<8x32xf32>, vector<32x64xf32>, vector<8x64xf32> -> vector<8x64xf32>
    %81 = vector.broadcast %10 : vector<1x64xf32> to vector<8x64xf32>
    %82 = arith.addf %80, %81 : vector<8x64xf32>
    %cst_36 = arith.constant dense<0.000000e+00> : vector<8x64xf32>
    %83 = tpu.matmul %58, %9, %cst_36 {dimension_numbers = #tpu.dot_dimension_numbers<[1], [0], [0], [1], [0, 0, 1, 1], [], []>} : vector<8x16xf32>, vector<16x64xf32>, vector<8x64xf32> -> vector<8x64xf32>
    %84 = arith.addf %82, %83 : vector<8x64xf32>
    %85 = arith.negf %84 : vector<8x64xf32>
    %86 = math.exp %85 : vector<8x64xf32>
    %cst_37 = arith.constant 1.000000e+00 : f32
    %87 = vector.broadcast %cst_37 : f32 to vector<8x64xf32>
    %88 = arith.addf %87, %86 : vector<8x64xf32>
    %89 = arith.divf %87, %88 : vector<8x64xf32>
    %90 = vector.extract_strided_slice %89 {offsets = [0, 0], sizes = [8, 16], strides = [1, 1]} : vector<8x64xf32> to vector<8x16xf32>
    %91 = vector.extract_strided_slice %89 {offsets = [0, 16], sizes = [8, 16], strides = [1, 1]} : vector<8x64xf32> to vector<8x16xf32>
    %92 = vector.extract_strided_slice %89 {offsets = [0, 32], sizes = [8, 16], strides = [1, 1]} : vector<8x64xf32> to vector<8x16xf32>
    %cst_38 = arith.constant 2.000000e+00 : f32
    %93 = vector.broadcast %cst_38 : f32 to vector<8x16xf32>
    %94 = arith.mulf %93, %92 : vector<8x16xf32>
    %cst_39 = arith.constant 1.000000e+00 : f32
    %95 = vector.broadcast %cst_39 : f32 to vector<8x16xf32>
    %96 = arith.subf %94, %95 : vector<8x16xf32>
    %97 = vector.extract_strided_slice %89 {offsets = [0, 48], sizes = [8, 16], strides = [1, 1]} : vector<8x64xf32> to vector<8x16xf32>
    %98 = arith.mulf %91, %56 : vector<8x16xf32>
    %99 = arith.mulf %90, %96 : vector<8x16xf32>
    %100 = arith.addf %98, %99 : vector<8x16xf32>
    %101 = math.tanh %100 : vector<8x16xf32>
    %102 = arith.mulf %97, %101 : vector<8x16xf32>
    %103 = vector.extract_strided_slice %6 {offsets = [16, 0], sizes = [8, 128], strides = [1, 1]} : vector<64x128xf32> to vector<8x128xf32>
    %cst_40 = arith.constant dense<0.000000e+00> : vector<8x128xf32>
    %104 = tpu.matmul %79, %7, %cst_40 {dimension_numbers = #tpu.dot_dimension_numbers<[1], [0], [0], [1], [0, 0, 1, 1], [], []>} : vector<8x32xf32>, vector<32x128xf32>, vector<8x128xf32> -> vector<8x128xf32>
    %105 = arith.addf %103, %104 : vector<8x128xf32>
    %106 = arith.negf %105 : vector<8x128xf32>
    %107 = math.exp %106 : vector<8x128xf32>
    %cst_41 = arith.constant 1.000000e+00 : f32
    %108 = vector.broadcast %cst_41 : f32 to vector<8x128xf32>
    %109 = arith.addf %108, %107 : vector<8x128xf32>
    %110 = arith.divf %108, %109 : vector<8x128xf32>
    %111 = vector.extract_strided_slice %110 {offsets = [0, 0], sizes = [8, 32], strides = [1, 1]} : vector<8x128xf32> to vector<8x32xf32>
    %112 = vector.extract_strided_slice %110 {offsets = [0, 32], sizes = [8, 32], strides = [1, 1]} : vector<8x128xf32> to vector<8x32xf32>
    %113 = vector.extract_strided_slice %110 {offsets = [0, 64], sizes = [8, 32], strides = [1, 1]} : vector<8x128xf32> to vector<8x32xf32>
    %cst_42 = arith.constant 2.000000e+00 : f32
    %114 = vector.broadcast %cst_42 : f32 to vector<8x32xf32>
    %115 = arith.mulf %114, %113 : vector<8x32xf32>
    %cst_43 = arith.constant 1.000000e+00 : f32
    %116 = vector.broadcast %cst_43 : f32 to vector<8x32xf32>
    %117 = arith.subf %115, %116 : vector<8x32xf32>
    %118 = vector.extract_strided_slice %110 {offsets = [0, 96], sizes = [8, 32], strides = [1, 1]} : vector<8x128xf32> to vector<8x32xf32>
    %119 = arith.mulf %112, %77 : vector<8x32xf32>
    %120 = arith.mulf %111, %117 : vector<8x32xf32>
    %121 = arith.addf %119, %120 : vector<8x32xf32>
    %122 = math.tanh %121 : vector<8x32xf32>
    %123 = arith.mulf %118, %122 : vector<8x32xf32>
    %cst_44 = arith.constant dense<0.000000e+00> : vector<8x64xf32>
    %124 = tpu.matmul %123, %8, %cst_44 {dimension_numbers = #tpu.dot_dimension_numbers<[1], [0], [0], [1], [0, 0, 1, 1], [], []>} : vector<8x32xf32>, vector<32x64xf32>, vector<8x64xf32> -> vector<8x64xf32>
    %125 = vector.broadcast %10 : vector<1x64xf32> to vector<8x64xf32>
    %126 = arith.addf %124, %125 : vector<8x64xf32>
    %cst_45 = arith.constant dense<0.000000e+00> : vector<8x64xf32>
    %127 = tpu.matmul %102, %9, %cst_45 {dimension_numbers = #tpu.dot_dimension_numbers<[1], [0], [0], [1], [0, 0, 1, 1], [], []>} : vector<8x16xf32>, vector<16x64xf32>, vector<8x64xf32> -> vector<8x64xf32>
    %128 = arith.addf %126, %127 : vector<8x64xf32>
    %129 = arith.negf %128 : vector<8x64xf32>
    %130 = math.exp %129 : vector<8x64xf32>
    %cst_46 = arith.constant 1.000000e+00 : f32
    %131 = vector.broadcast %cst_46 : f32 to vector<8x64xf32>
    %132 = arith.addf %131, %130 : vector<8x64xf32>
    %133 = arith.divf %131, %132 : vector<8x64xf32>
    %134 = vector.extract_strided_slice %133 {offsets = [0, 0], sizes = [8, 16], strides = [1, 1]} : vector<8x64xf32> to vector<8x16xf32>
    %135 = vector.extract_strided_slice %133 {offsets = [0, 16], sizes = [8, 16], strides = [1, 1]} : vector<8x64xf32> to vector<8x16xf32>
    %136 = vector.extract_strided_slice %133 {offsets = [0, 32], sizes = [8, 16], strides = [1, 1]} : vector<8x64xf32> to vector<8x16xf32>
    %cst_47 = arith.constant 2.000000e+00 : f32
    %137 = vector.broadcast %cst_47 : f32 to vector<8x16xf32>
    %138 = arith.mulf %137, %136 : vector<8x16xf32>
    %cst_48 = arith.constant 1.000000e+00 : f32
    %139 = vector.broadcast %cst_48 : f32 to vector<8x16xf32>
    %140 = arith.subf %138, %139 : vector<8x16xf32>
    %141 = vector.extract_strided_slice %133 {offsets = [0, 48], sizes = [8, 16], strides = [1, 1]} : vector<8x64xf32> to vector<8x16xf32>
    %142 = arith.mulf %135, %100 : vector<8x16xf32>
    %143 = arith.mulf %134, %140 : vector<8x16xf32>
    %144 = arith.addf %142, %143 : vector<8x16xf32>
    %145 = math.tanh %144 : vector<8x16xf32>
    %146 = arith.mulf %141, %145 : vector<8x16xf32>
    %147 = vector.extract_strided_slice %6 {offsets = [24, 0], sizes = [8, 128], strides = [1, 1]} : vector<64x128xf32> to vector<8x128xf32>
    %cst_49 = arith.constant dense<0.000000e+00> : vector<8x128xf32>
    %148 = tpu.matmul %123, %7, %cst_49 {dimension_numbers = #tpu.dot_dimension_numbers<[1], [0], [0], [1], [0, 0, 1, 1], [], []>} : vector<8x32xf32>, vector<32x128xf32>, vector<8x128xf32> -> vector<8x128xf32>
    %149 = arith.addf %147, %148 : vector<8x128xf32>
    %150 = arith.negf %149 : vector<8x128xf32>
    %151 = math.exp %150 : vector<8x128xf32>
    %cst_50 = arith.constant 1.000000e+00 : f32
    %152 = vector.broadcast %cst_50 : f32 to vector<8x128xf32>
    %153 = arith.addf %152, %151 : vector<8x128xf32>
    %154 = arith.divf %152, %153 : vector<8x128xf32>
    %155 = vector.extract_strided_slice %154 {offsets = [0, 0], sizes = [8, 32], strides = [1, 1]} : vector<8x128xf32> to vector<8x32xf32>
    %156 = vector.extract_strided_slice %154 {offsets = [0, 32], sizes = [8, 32], strides = [1, 1]} : vector<8x128xf32> to vector<8x32xf32>
    %157 = vector.extract_strided_slice %154 {offsets = [0, 64], sizes = [8, 32], strides = [1, 1]} : vector<8x128xf32> to vector<8x32xf32>
    %cst_51 = arith.constant 2.000000e+00 : f32
    %158 = vector.broadcast %cst_51 : f32 to vector<8x32xf32>
    %159 = arith.mulf %158, %157 : vector<8x32xf32>
    %cst_52 = arith.constant 1.000000e+00 : f32
    %160 = vector.broadcast %cst_52 : f32 to vector<8x32xf32>
    %161 = arith.subf %159, %160 : vector<8x32xf32>
    %162 = vector.extract_strided_slice %154 {offsets = [0, 96], sizes = [8, 32], strides = [1, 1]} : vector<8x128xf32> to vector<8x32xf32>
    %163 = arith.mulf %156, %121 : vector<8x32xf32>
    %164 = arith.mulf %155, %161 : vector<8x32xf32>
    %165 = arith.addf %163, %164 : vector<8x32xf32>
    %166 = math.tanh %165 : vector<8x32xf32>
    %167 = arith.mulf %162, %166 : vector<8x32xf32>
    %cst_53 = arith.constant dense<0.000000e+00> : vector<8x64xf32>
    %168 = tpu.matmul %167, %8, %cst_53 {dimension_numbers = #tpu.dot_dimension_numbers<[1], [0], [0], [1], [0, 0, 1, 1], [], []>} : vector<8x32xf32>, vector<32x64xf32>, vector<8x64xf32> -> vector<8x64xf32>
    %169 = vector.broadcast %10 : vector<1x64xf32> to vector<8x64xf32>
    %170 = arith.addf %168, %169 : vector<8x64xf32>
    %cst_54 = arith.constant dense<0.000000e+00> : vector<8x64xf32>
    %171 = tpu.matmul %146, %9, %cst_54 {dimension_numbers = #tpu.dot_dimension_numbers<[1], [0], [0], [1], [0, 0, 1, 1], [], []>} : vector<8x16xf32>, vector<16x64xf32>, vector<8x64xf32> -> vector<8x64xf32>
    %172 = arith.addf %170, %171 : vector<8x64xf32>
    %173 = arith.negf %172 : vector<8x64xf32>
    %174 = math.exp %173 : vector<8x64xf32>
    %cst_55 = arith.constant 1.000000e+00 : f32
    %175 = vector.broadcast %cst_55 : f32 to vector<8x64xf32>
    %176 = arith.addf %175, %174 : vector<8x64xf32>
    %177 = arith.divf %175, %176 : vector<8x64xf32>
    %178 = vector.extract_strided_slice %177 {offsets = [0, 0], sizes = [8, 16], strides = [1, 1]} : vector<8x64xf32> to vector<8x16xf32>
    %179 = vector.extract_strided_slice %177 {offsets = [0, 16], sizes = [8, 16], strides = [1, 1]} : vector<8x64xf32> to vector<8x16xf32>
    %180 = vector.extract_strided_slice %177 {offsets = [0, 32], sizes = [8, 16], strides = [1, 1]} : vector<8x64xf32> to vector<8x16xf32>
    %cst_56 = arith.constant 2.000000e+00 : f32
    %181 = vector.broadcast %cst_56 : f32 to vector<8x16xf32>
    %182 = arith.mulf %181, %180 : vector<8x16xf32>
    %cst_57 = arith.constant 1.000000e+00 : f32
    %183 = vector.broadcast %cst_57 : f32 to vector<8x16xf32>
    %184 = arith.subf %182, %183 : vector<8x16xf32>
    %185 = vector.extract_strided_slice %177 {offsets = [0, 48], sizes = [8, 16], strides = [1, 1]} : vector<8x64xf32> to vector<8x16xf32>
    %186 = arith.mulf %179, %144 : vector<8x16xf32>
    %187 = arith.mulf %178, %184 : vector<8x16xf32>
    %188 = arith.addf %186, %187 : vector<8x16xf32>
    %189 = math.tanh %188 : vector<8x16xf32>
    %190 = arith.mulf %185, %189 : vector<8x16xf32>
    %191 = vector.extract_strided_slice %6 {offsets = [32, 0], sizes = [8, 128], strides = [1, 1]} : vector<64x128xf32> to vector<8x128xf32>
    %cst_58 = arith.constant dense<0.000000e+00> : vector<8x128xf32>
    %192 = tpu.matmul %167, %7, %cst_58 {dimension_numbers = #tpu.dot_dimension_numbers<[1], [0], [0], [1], [0, 0, 1, 1], [], []>} : vector<8x32xf32>, vector<32x128xf32>, vector<8x128xf32> -> vector<8x128xf32>
    %193 = arith.addf %191, %192 : vector<8x128xf32>
    %194 = arith.negf %193 : vector<8x128xf32>
    %195 = math.exp %194 : vector<8x128xf32>
    %cst_59 = arith.constant 1.000000e+00 : f32
    %196 = vector.broadcast %cst_59 : f32 to vector<8x128xf32>
    %197 = arith.addf %196, %195 : vector<8x128xf32>
    %198 = arith.divf %196, %197 : vector<8x128xf32>
    %199 = vector.extract_strided_slice %198 {offsets = [0, 0], sizes = [8, 32], strides = [1, 1]} : vector<8x128xf32> to vector<8x32xf32>
    %200 = vector.extract_strided_slice %198 {offsets = [0, 32], sizes = [8, 32], strides = [1, 1]} : vector<8x128xf32> to vector<8x32xf32>
    %201 = vector.extract_strided_slice %198 {offsets = [0, 64], sizes = [8, 32], strides = [1, 1]} : vector<8x128xf32> to vector<8x32xf32>
    %cst_60 = arith.constant 2.000000e+00 : f32
    %202 = vector.broadcast %cst_60 : f32 to vector<8x32xf32>
    %203 = arith.mulf %202, %201 : vector<8x32xf32>
    %cst_61 = arith.constant 1.000000e+00 : f32
    %204 = vector.broadcast %cst_61 : f32 to vector<8x32xf32>
    %205 = arith.subf %203, %204 : vector<8x32xf32>
    %206 = vector.extract_strided_slice %198 {offsets = [0, 96], sizes = [8, 32], strides = [1, 1]} : vector<8x128xf32> to vector<8x32xf32>
    %207 = arith.mulf %200, %165 : vector<8x32xf32>
    %208 = arith.mulf %199, %205 : vector<8x32xf32>
    %209 = arith.addf %207, %208 : vector<8x32xf32>
    %210 = math.tanh %209 : vector<8x32xf32>
    %211 = arith.mulf %206, %210 : vector<8x32xf32>
    %cst_62 = arith.constant dense<0.000000e+00> : vector<8x64xf32>
    %212 = tpu.matmul %211, %8, %cst_62 {dimension_numbers = #tpu.dot_dimension_numbers<[1], [0], [0], [1], [0, 0, 1, 1], [], []>} : vector<8x32xf32>, vector<32x64xf32>, vector<8x64xf32> -> vector<8x64xf32>
    %213 = vector.broadcast %10 : vector<1x64xf32> to vector<8x64xf32>
    %214 = arith.addf %212, %213 : vector<8x64xf32>
    %cst_63 = arith.constant dense<0.000000e+00> : vector<8x64xf32>
    %215 = tpu.matmul %190, %9, %cst_63 {dimension_numbers = #tpu.dot_dimension_numbers<[1], [0], [0], [1], [0, 0, 1, 1], [], []>} : vector<8x16xf32>, vector<16x64xf32>, vector<8x64xf32> -> vector<8x64xf32>
    %216 = arith.addf %214, %215 : vector<8x64xf32>
    %217 = arith.negf %216 : vector<8x64xf32>
    %218 = math.exp %217 : vector<8x64xf32>
    %cst_64 = arith.constant 1.000000e+00 : f32
    %219 = vector.broadcast %cst_64 : f32 to vector<8x64xf32>
    %220 = arith.addf %219, %218 : vector<8x64xf32>
    %221 = arith.divf %219, %220 : vector<8x64xf32>
    %222 = vector.extract_strided_slice %221 {offsets = [0, 0], sizes = [8, 16], strides = [1, 1]} : vector<8x64xf32> to vector<8x16xf32>
    %223 = vector.extract_strided_slice %221 {offsets = [0, 16], sizes = [8, 16], strides = [1, 1]} : vector<8x64xf32> to vector<8x16xf32>
    %224 = vector.extract_strided_slice %221 {offsets = [0, 32], sizes = [8, 16], strides = [1, 1]} : vector<8x64xf32> to vector<8x16xf32>
    %cst_65 = arith.constant 2.000000e+00 : f32
    %225 = vector.broadcast %cst_65 : f32 to vector<8x16xf32>
    %226 = arith.mulf %225, %224 : vector<8x16xf32>
    %cst_66 = arith.constant 1.000000e+00 : f32
    %227 = vector.broadcast %cst_66 : f32 to vector<8x16xf32>
    %228 = arith.subf %226, %227 : vector<8x16xf32>
    %229 = vector.extract_strided_slice %221 {offsets = [0, 48], sizes = [8, 16], strides = [1, 1]} : vector<8x64xf32> to vector<8x16xf32>
    %230 = arith.mulf %223, %188 : vector<8x16xf32>
    %231 = arith.mulf %222, %228 : vector<8x16xf32>
    %232 = arith.addf %230, %231 : vector<8x16xf32>
    %233 = math.tanh %232 : vector<8x16xf32>
    %234 = arith.mulf %229, %233 : vector<8x16xf32>
    %235 = vector.extract_strided_slice %6 {offsets = [40, 0], sizes = [8, 128], strides = [1, 1]} : vector<64x128xf32> to vector<8x128xf32>
    %cst_67 = arith.constant dense<0.000000e+00> : vector<8x128xf32>
    %236 = tpu.matmul %211, %7, %cst_67 {dimension_numbers = #tpu.dot_dimension_numbers<[1], [0], [0], [1], [0, 0, 1, 1], [], []>} : vector<8x32xf32>, vector<32x128xf32>, vector<8x128xf32> -> vector<8x128xf32>
    %237 = arith.addf %235, %236 : vector<8x128xf32>
    %238 = arith.negf %237 : vector<8x128xf32>
    %239 = math.exp %238 : vector<8x128xf32>
    %cst_68 = arith.constant 1.000000e+00 : f32
    %240 = vector.broadcast %cst_68 : f32 to vector<8x128xf32>
    %241 = arith.addf %240, %239 : vector<8x128xf32>
    %242 = arith.divf %240, %241 : vector<8x128xf32>
    %243 = vector.extract_strided_slice %242 {offsets = [0, 0], sizes = [8, 32], strides = [1, 1]} : vector<8x128xf32> to vector<8x32xf32>
    %244 = vector.extract_strided_slice %242 {offsets = [0, 32], sizes = [8, 32], strides = [1, 1]} : vector<8x128xf32> to vector<8x32xf32>
    %245 = vector.extract_strided_slice %242 {offsets = [0, 64], sizes = [8, 32], strides = [1, 1]} : vector<8x128xf32> to vector<8x32xf32>
    %cst_69 = arith.constant 2.000000e+00 : f32
    %246 = vector.broadcast %cst_69 : f32 to vector<8x32xf32>
    %247 = arith.mulf %246, %245 : vector<8x32xf32>
    %cst_70 = arith.constant 1.000000e+00 : f32
    %248 = vector.broadcast %cst_70 : f32 to vector<8x32xf32>
    %249 = arith.subf %247, %248 : vector<8x32xf32>
    %250 = vector.extract_strided_slice %242 {offsets = [0, 96], sizes = [8, 32], strides = [1, 1]} : vector<8x128xf32> to vector<8x32xf32>
    %251 = arith.mulf %244, %209 : vector<8x32xf32>
    %252 = arith.mulf %243, %249 : vector<8x32xf32>
    %253 = arith.addf %251, %252 : vector<8x32xf32>
    %254 = math.tanh %253 : vector<8x32xf32>
    %255 = arith.mulf %250, %254 : vector<8x32xf32>
    %cst_71 = arith.constant dense<0.000000e+00> : vector<8x64xf32>
    %256 = tpu.matmul %255, %8, %cst_71 {dimension_numbers = #tpu.dot_dimension_numbers<[1], [0], [0], [1], [0, 0, 1, 1], [], []>} : vector<8x32xf32>, vector<32x64xf32>, vector<8x64xf32> -> vector<8x64xf32>
    %257 = vector.broadcast %10 : vector<1x64xf32> to vector<8x64xf32>
    %258 = arith.addf %256, %257 : vector<8x64xf32>
    %cst_72 = arith.constant dense<0.000000e+00> : vector<8x64xf32>
    %259 = tpu.matmul %234, %9, %cst_72 {dimension_numbers = #tpu.dot_dimension_numbers<[1], [0], [0], [1], [0, 0, 1, 1], [], []>} : vector<8x16xf32>, vector<16x64xf32>, vector<8x64xf32> -> vector<8x64xf32>
    %260 = arith.addf %258, %259 : vector<8x64xf32>
    %261 = arith.negf %260 : vector<8x64xf32>
    %262 = math.exp %261 : vector<8x64xf32>
    %cst_73 = arith.constant 1.000000e+00 : f32
    %263 = vector.broadcast %cst_73 : f32 to vector<8x64xf32>
    %264 = arith.addf %263, %262 : vector<8x64xf32>
    %265 = arith.divf %263, %264 : vector<8x64xf32>
    %266 = vector.extract_strided_slice %265 {offsets = [0, 0], sizes = [8, 16], strides = [1, 1]} : vector<8x64xf32> to vector<8x16xf32>
    %267 = vector.extract_strided_slice %265 {offsets = [0, 16], sizes = [8, 16], strides = [1, 1]} : vector<8x64xf32> to vector<8x16xf32>
    %268 = vector.extract_strided_slice %265 {offsets = [0, 32], sizes = [8, 16], strides = [1, 1]} : vector<8x64xf32> to vector<8x16xf32>
    %cst_74 = arith.constant 2.000000e+00 : f32
    %269 = vector.broadcast %cst_74 : f32 to vector<8x16xf32>
    %270 = arith.mulf %269, %268 : vector<8x16xf32>
    %cst_75 = arith.constant 1.000000e+00 : f32
    %271 = vector.broadcast %cst_75 : f32 to vector<8x16xf32>
    %272 = arith.subf %270, %271 : vector<8x16xf32>
    %273 = vector.extract_strided_slice %265 {offsets = [0, 48], sizes = [8, 16], strides = [1, 1]} : vector<8x64xf32> to vector<8x16xf32>
    %274 = arith.mulf %267, %232 : vector<8x16xf32>
    %275 = arith.mulf %266, %272 : vector<8x16xf32>
    %276 = arith.addf %274, %275 : vector<8x16xf32>
    %277 = math.tanh %276 : vector<8x16xf32>
    %278 = arith.mulf %273, %277 : vector<8x16xf32>
    %279 = vector.extract_strided_slice %6 {offsets = [48, 0], sizes = [8, 128], strides = [1, 1]} : vector<64x128xf32> to vector<8x128xf32>
    %cst_76 = arith.constant dense<0.000000e+00> : vector<8x128xf32>
    %280 = tpu.matmul %255, %7, %cst_76 {dimension_numbers = #tpu.dot_dimension_numbers<[1], [0], [0], [1], [0, 0, 1, 1], [], []>} : vector<8x32xf32>, vector<32x128xf32>, vector<8x128xf32> -> vector<8x128xf32>
    %281 = arith.addf %279, %280 : vector<8x128xf32>
    %282 = arith.negf %281 : vector<8x128xf32>
    %283 = math.exp %282 : vector<8x128xf32>
    %cst_77 = arith.constant 1.000000e+00 : f32
    %284 = vector.broadcast %cst_77 : f32 to vector<8x128xf32>
    %285 = arith.addf %284, %283 : vector<8x128xf32>
    %286 = arith.divf %284, %285 : vector<8x128xf32>
    %287 = vector.extract_strided_slice %286 {offsets = [0, 0], sizes = [8, 32], strides = [1, 1]} : vector<8x128xf32> to vector<8x32xf32>
    %288 = vector.extract_strided_slice %286 {offsets = [0, 32], sizes = [8, 32], strides = [1, 1]} : vector<8x128xf32> to vector<8x32xf32>
    %289 = vector.extract_strided_slice %286 {offsets = [0, 64], sizes = [8, 32], strides = [1, 1]} : vector<8x128xf32> to vector<8x32xf32>
    %cst_78 = arith.constant 2.000000e+00 : f32
    %290 = vector.broadcast %cst_78 : f32 to vector<8x32xf32>
    %291 = arith.mulf %290, %289 : vector<8x32xf32>
    %cst_79 = arith.constant 1.000000e+00 : f32
    %292 = vector.broadcast %cst_79 : f32 to vector<8x32xf32>
    %293 = arith.subf %291, %292 : vector<8x32xf32>
    %294 = vector.extract_strided_slice %286 {offsets = [0, 96], sizes = [8, 32], strides = [1, 1]} : vector<8x128xf32> to vector<8x32xf32>
    %295 = arith.mulf %288, %253 : vector<8x32xf32>
    %296 = arith.mulf %287, %293 : vector<8x32xf32>
    %297 = arith.addf %295, %296 : vector<8x32xf32>
    %298 = math.tanh %297 : vector<8x32xf32>
    %299 = arith.mulf %294, %298 : vector<8x32xf32>
    %cst_80 = arith.constant dense<0.000000e+00> : vector<8x64xf32>
    %300 = tpu.matmul %299, %8, %cst_80 {dimension_numbers = #tpu.dot_dimension_numbers<[1], [0], [0], [1], [0, 0, 1, 1], [], []>} : vector<8x32xf32>, vector<32x64xf32>, vector<8x64xf32> -> vector<8x64xf32>
    %301 = vector.broadcast %10 : vector<1x64xf32> to vector<8x64xf32>
    %302 = arith.addf %300, %301 : vector<8x64xf32>
    %cst_81 = arith.constant dense<0.000000e+00> : vector<8x64xf32>
    %303 = tpu.matmul %278, %9, %cst_81 {dimension_numbers = #tpu.dot_dimension_numbers<[1], [0], [0], [1], [0, 0, 1, 1], [], []>} : vector<8x16xf32>, vector<16x64xf32>, vector<8x64xf32> -> vector<8x64xf32>
    %304 = arith.addf %302, %303 : vector<8x64xf32>
    %305 = arith.negf %304 : vector<8x64xf32>
    %306 = math.exp %305 : vector<8x64xf32>
    %cst_82 = arith.constant 1.000000e+00 : f32
    %307 = vector.broadcast %cst_82 : f32 to vector<8x64xf32>
    %308 = arith.addf %307, %306 : vector<8x64xf32>
    %309 = arith.divf %307, %308 : vector<8x64xf32>
    %310 = vector.extract_strided_slice %309 {offsets = [0, 0], sizes = [8, 16], strides = [1, 1]} : vector<8x64xf32> to vector<8x16xf32>
    %311 = vector.extract_strided_slice %309 {offsets = [0, 16], sizes = [8, 16], strides = [1, 1]} : vector<8x64xf32> to vector<8x16xf32>
    %312 = vector.extract_strided_slice %309 {offsets = [0, 32], sizes = [8, 16], strides = [1, 1]} : vector<8x64xf32> to vector<8x16xf32>
    %cst_83 = arith.constant 2.000000e+00 : f32
    %313 = vector.broadcast %cst_83 : f32 to vector<8x16xf32>
    %314 = arith.mulf %313, %312 : vector<8x16xf32>
    %cst_84 = arith.constant 1.000000e+00 : f32
    %315 = vector.broadcast %cst_84 : f32 to vector<8x16xf32>
    %316 = arith.subf %314, %315 : vector<8x16xf32>
    %317 = vector.extract_strided_slice %309 {offsets = [0, 48], sizes = [8, 16], strides = [1, 1]} : vector<8x64xf32> to vector<8x16xf32>
    %318 = arith.mulf %311, %276 : vector<8x16xf32>
    %319 = arith.mulf %310, %316 : vector<8x16xf32>
    %320 = arith.addf %318, %319 : vector<8x16xf32>
    %321 = math.tanh %320 : vector<8x16xf32>
    %322 = arith.mulf %317, %321 : vector<8x16xf32>
    %323 = vector.extract_strided_slice %6 {offsets = [56, 0], sizes = [8, 128], strides = [1, 1]} : vector<64x128xf32> to vector<8x128xf32>
    %cst_85 = arith.constant dense<0.000000e+00> : vector<8x128xf32>
    %324 = tpu.matmul %299, %7, %cst_85 {dimension_numbers = #tpu.dot_dimension_numbers<[1], [0], [0], [1], [0, 0, 1, 1], [], []>} : vector<8x32xf32>, vector<32x128xf32>, vector<8x128xf32> -> vector<8x128xf32>
    %325 = arith.addf %323, %324 : vector<8x128xf32>
    %326 = arith.negf %325 : vector<8x128xf32>
    %327 = math.exp %326 : vector<8x128xf32>
    %cst_86 = arith.constant 1.000000e+00 : f32
    %328 = vector.broadcast %cst_86 : f32 to vector<8x128xf32>
    %329 = arith.addf %328, %327 : vector<8x128xf32>
    %330 = arith.divf %328, %329 : vector<8x128xf32>
    %331 = vector.extract_strided_slice %330 {offsets = [0, 0], sizes = [8, 32], strides = [1, 1]} : vector<8x128xf32> to vector<8x32xf32>
    %332 = vector.extract_strided_slice %330 {offsets = [0, 32], sizes = [8, 32], strides = [1, 1]} : vector<8x128xf32> to vector<8x32xf32>
    %333 = vector.extract_strided_slice %330 {offsets = [0, 64], sizes = [8, 32], strides = [1, 1]} : vector<8x128xf32> to vector<8x32xf32>
    %cst_87 = arith.constant 2.000000e+00 : f32
    %334 = vector.broadcast %cst_87 : f32 to vector<8x32xf32>
    %335 = arith.mulf %334, %333 : vector<8x32xf32>
    %cst_88 = arith.constant 1.000000e+00 : f32
    %336 = vector.broadcast %cst_88 : f32 to vector<8x32xf32>
    %337 = arith.subf %335, %336 : vector<8x32xf32>
    %338 = vector.extract_strided_slice %330 {offsets = [0, 96], sizes = [8, 32], strides = [1, 1]} : vector<8x128xf32> to vector<8x32xf32>
    %339 = arith.mulf %332, %297 : vector<8x32xf32>
    %340 = arith.mulf %331, %337 : vector<8x32xf32>
    %341 = arith.addf %339, %340 : vector<8x32xf32>
    %342 = math.tanh %341 : vector<8x32xf32>
    %343 = arith.mulf %338, %342 : vector<8x32xf32>
    %cst_89 = arith.constant dense<0.000000e+00> : vector<8x64xf32>
    %344 = tpu.matmul %343, %8, %cst_89 {dimension_numbers = #tpu.dot_dimension_numbers<[1], [0], [0], [1], [0, 0, 1, 1], [], []>} : vector<8x32xf32>, vector<32x64xf32>, vector<8x64xf32> -> vector<8x64xf32>
    %345 = vector.broadcast %10 : vector<1x64xf32> to vector<8x64xf32>
    %346 = arith.addf %344, %345 : vector<8x64xf32>
    %cst_90 = arith.constant dense<0.000000e+00> : vector<8x64xf32>
    %347 = tpu.matmul %322, %9, %cst_90 {dimension_numbers = #tpu.dot_dimension_numbers<[1], [0], [0], [1], [0, 0, 1, 1], [], []>} : vector<8x16xf32>, vector<16x64xf32>, vector<8x64xf32> -> vector<8x64xf32>
    %348 = arith.addf %346, %347 : vector<8x64xf32>
    %349 = arith.negf %348 : vector<8x64xf32>
    %350 = math.exp %349 : vector<8x64xf32>
    %cst_91 = arith.constant 1.000000e+00 : f32
    %351 = vector.broadcast %cst_91 : f32 to vector<8x64xf32>
    %352 = arith.addf %351, %350 : vector<8x64xf32>
    %353 = arith.divf %351, %352 : vector<8x64xf32>
    %354 = vector.extract_strided_slice %353 {offsets = [0, 0], sizes = [8, 16], strides = [1, 1]} : vector<8x64xf32> to vector<8x16xf32>
    %355 = vector.extract_strided_slice %353 {offsets = [0, 16], sizes = [8, 16], strides = [1, 1]} : vector<8x64xf32> to vector<8x16xf32>
    %356 = vector.extract_strided_slice %353 {offsets = [0, 32], sizes = [8, 16], strides = [1, 1]} : vector<8x64xf32> to vector<8x16xf32>
    %cst_92 = arith.constant 2.000000e+00 : f32
    %357 = vector.broadcast %cst_92 : f32 to vector<8x16xf32>
    %358 = arith.mulf %357, %356 : vector<8x16xf32>
    %cst_93 = arith.constant 1.000000e+00 : f32
    %359 = vector.broadcast %cst_93 : f32 to vector<8x16xf32>
    %360 = arith.subf %358, %359 : vector<8x16xf32>
    %361 = vector.extract_strided_slice %353 {offsets = [0, 48], sizes = [8, 16], strides = [1, 1]} : vector<8x64xf32> to vector<8x16xf32>
    %362 = arith.mulf %355, %320 : vector<8x16xf32>
    %363 = arith.mulf %354, %360 : vector<8x16xf32>
    %364 = arith.addf %362, %363 : vector<8x16xf32>
    %365 = math.tanh %364 : vector<8x16xf32>
    %366 = arith.mulf %361, %365 : vector<8x16xf32>
    %c0_94 = arith.constant 0 : index
    %c0_95 = arith.constant 0 : index
    %367 = vector.load %arg8[%c0_94, %c0_95] : memref<16x4xf32, #tpu.memory_space<vmem>>, vector<16x4xf32>
    %cst_96 = arith.constant dense<0.000000e+00> : vector<8x4xf32>
    %368 = tpu.matmul %366, %367, %cst_96 {dimension_numbers = #tpu.dot_dimension_numbers<[1], [0], [0], [1], [0, 0, 1, 1], [], []>} : vector<8x16xf32>, vector<16x4xf32>, vector<8x4xf32> -> vector<8x4xf32>
    %c0_97 = arith.constant 0 : index
    %c0_98 = arith.constant 0 : index
    %369 = vector.load %arg9[%c0_97, %c0_98] : memref<1x4xf32, #tpu.memory_space<vmem>>, vector<1x4xf32>
    %370 = vector.broadcast %369 : vector<1x4xf32> to vector<8x4xf32>
    %371 = arith.addf %368, %370 : vector<8x4xf32>
    %cst_99 = arith.constant dense<0xFF800000> : vector<8xf32>
    %372 = vector.multi_reduction <maximumf>, %371, %cst_99 [1] : vector<8x4xf32> to vector<8xf32>
    %373 = vector.shape_cast %372 : vector<8xf32> to vector<8x1xf32>
    %374 = vector.broadcast %373 : vector<8x1xf32> to vector<8x4xf32>
    %375 = arith.subf %371, %374 : vector<8x4xf32>
    %376 = math.exp %375 : vector<8x4xf32>
    %cst_100 = arith.constant dense<0.000000e+00> : vector<8xf32>
    %377 = vector.multi_reduction <add>, %376, %cst_100 [1] : vector<8x4xf32> to vector<8xf32>
    %378 = vector.shape_cast %377 : vector<8xf32> to vector<8x1xf32>
    %379 = tpu.reciprocal %378 {approx = true} : vector<8x1xf32> -> vector<8x1xf32>
    %380 = vector.broadcast %379 : vector<8x1xf32> to vector<8x4xf32>
    %381 = arith.mulf %376, %380 : vector<8x4xf32>
    %c0_101 = arith.constant 0 : index
    %c0_102 = arith.constant 0 : index
    %382 = vector.load %arg14[%c0_101, %c0_102] : memref<8x4xf32, #tpu.memory_space<vmem>>, vector<8x4xf32>
    tpu.vector_store %arg14[%c0_101, %c0_102], %381 {strides = array<i32>} : memref<8x4xf32, #tpu.memory_space<vmem>>, vector<8x4xf32>,
    return
  }
  func.func @transform_0(%arg0: i32) -> (i32, i32, i32) {
    %c0_i32 = arith.constant 0 : i32
    %c0_i32_0 = arith.constant 0 : i32
    %c0_i32_1 = arith.constant 0 : i32
    return %arg0, %c0_i32, %c0_i32_0 : i32, i32, i32
  }
  func.func @transform_1(%arg0: i32) -> (i32, i32) {
    %c0_i32 = arith.constant 0 : i32
    %c0_i32_0 = arith.constant 0 : i32
    %c0_i32_1 = arith.constant 0 : i32
    return %c0_i32, %c0_i32_0 : i32, i32
  }
  func.func @transform_2(%arg0: i32) -> (i32, i32) {
    %c0_i32 = arith.constant 0 : i32
    %c0_i32_0 = arith.constant 0 : i32
    %c0_i32_1 = arith.constant 0 : i32
    return %c0_i32, %c0_i32_0 : i32, i32
  }
  func.func @transform_3(%arg0: i32) -> (i32, i32) {
    %c0_i32 = arith.constant 0 : i32
    %c0_i32_0 = arith.constant 0 : i32
    %c0_i32_1 = arith.constant 0 : i32
    return %c0_i32, %c0_i32_0 : i32, i32
  }
  func.func @transform_4(%arg0: i32) -> (i32, i32) {
    %c0_i32 = arith.constant 0 : i32
    %c0_i32_0 = arith.constant 0 : i32
    %c0_i32_1 = arith.constant 0 : i32
    return %c0_i32, %c0_i32_0 : i32, i32
  }
  func.func @transform_5(%arg0: i32) -> (i32, i32) {
    %c0_i32 = arith.constant 0 : i32
    %c0_i32_0 = arith.constant 0 : i32
    %c0_i32_1 = arith.constant 0 : i32
    return %c0_i32, %c0_i32_0 : i32, i32
  }
  func.func @transform_6(%arg0: i32) -> (i32, i32) {
    %c0_i32 = arith.constant 0 : i32
    %c0_i32_0 = arith.constant 0 : i32
    %c0_i32_1 = arith.constant 0 : i32
    return %c0_i32, %c0_i32_0 : i32, i32
  }
  func.func @transform_7(%arg0: i32) -> (i32, i32) {
    %c0_i32 = arith.constant 0 : i32
    %c0_i32_0 = arith.constant 0 : i32
    %c0_i32_1 = arith.constant 0 : i32
    return %c0_i32, %c0_i32_0 : i32, i32
  }
  func.func @transform_8(%arg0: i32) -> (i32, i32) {
    %c0_i32 = arith.constant 0 : i32
    %c0_i32_0 = arith.constant 0 : i32
    %c0_i32_1 = arith.constant 0 : i32
    return %c0_i32, %c0_i32_0 : i32, i32
  }
  func.func @transform_9(%arg0: i32) -> (i32, i32) {
    %c0_i32 = arith.constant 0 : i32
    %c0_i32_0 = arith.constant 0 : i32
    return %arg0, %c0_i32 : i32, i32
  }
  func.func @transform_10(%arg0: i32) -> (i32, i32) {
    %c0_i32 = arith.constant 0 : i32
    %c0_i32_0 = arith.constant 0 : i32
    return %arg0, %c0_i32 : i32, i32
  }
  func.func @transform_11(%arg0: i32) -> (i32, i32) {
    %c0_i32 = arith.constant 0 : i32
    %c0_i32_0 = arith.constant 0 : i32
    return %arg0, %c0_i32 : i32, i32
  }
  func.func @transform_12(%arg0: i32) -> (i32, i32) {
    %c0_i32 = arith.constant 0 : i32
    %c0_i32_0 = arith.constant 0 : i32
    return %arg0, %c0_i32 : i32, i32
  }
  func.func @transform_13(%arg0: i32) -> (i32, i32) {
    %c0_i32 = arith.constant 0 : i32
    %c0_i32_0 = arith.constant 0 : i32
    return %arg0, %c0_i32 : i32, i32
  }
}

</mosaic_0001>

<bundles_post_ra>
// kernel: tpu_custom_call.1
= control target key start
LH: loop header
LB: loop body
LE: loop exit
PB: predicated region body
PF: predicated region fallthrough
CT: control target
= control target key end

     0   :  { %18 = vsyncpa [#allocation3], 0  ;;  %s3933_s25 = smov 0   ;;  %s4391_s0 = inlined_call_operand.vmem [shape: f32[2,64,8], index: 0, kind: input, shape index: {}]   ;;  %s4392_s1 = inlined_call_operand.hbm [shape: f32[8,128], index: 1, kind: input, shape index: {}]   ;;  %s4393_s2 = inlined_call_operand.vmem [shape: f32[32,128], index: 2, kind: input, shape index: {}]   ;;  %s4394_s3 = inlined_call_operand.vmem [shape: f32[1,128], index: 3, kind: input, shape index: {}]   ;;  %s4395_s4 = inlined_call_operand.vmem [shape: f32[32,64], index: 4, kind: input, shape index: {}]   ;;  %s4396_s5 = inlined_call_operand.vmem [shape: f32[16,64], index: 5, kind: input, shape index: {}]   ;;  %s4397_s6 = inlined_call_operand.vmem [shape: f32[1,64], index: 6, kind: input, shape index: {}]   ;;  %s4398_s7 = inlined_call_operand.vmem [shape: f32[16,4], index: 7, kind: input, shape index: {}]   ;;  %s4399_s8 = inlined_call_operand.vmem [shape: f32[1,4], index: 8, kind: input, shape index: {}]   ;;  %s4400_s9 = inlined_call_operand.vmem [shape: f32[16,32], index: 9, kind: input, shape index: {}]   ;;  %s4401_s10 = inlined_call_operand.vmem [shape: f32[16,32], index: 10, kind: input, shape index: {}]   ;;  %s4402_s11 = inlined_call_operand.vmem [shape: f32[16,16], index: 11, kind: input, shape index: {}]   ;;  %s4403_s12 = inlined_call_operand.vmem [shape: f32[16,16], index: 12, kind: input, shape index: {}]   ;;  %s4404_s13 = inlined_call_operand.vmem [shape: f32[16,4], index: 13, kind: output, shape index: {}]  }
   0x1 LB: > { %s3939_s26 = sadd.s32 4294967295, %s3852_s25   ;;  %p3086_p0 = scmp.ge.s32.totalorder %s3852_s25, 1  ;;  %s3852_s25 = sphi %s3933_s25, %s24_s25  }
   0x2   : > { %p353_p1 = scmp.lt.s32.totalorder %s3852_s25, 3  ;;  %p4405_p3 = scmp.eq.s32.totalorder %s3939_s26, 0 }
   0x3   : > { %s3854_s28 = smov [#allocation2]   ;;  %s3814_s16 = scalar_lea.hbm %s4392_s1, 128 }
   0x4   : > { %p3943_p2 = pnand %p3086_p0, %p353_p1  ;;  %s366_s29 = sshll.u32 %s3854_s28, 4  ;;  %s367_s29 = int_to_ptr.vmem [resolvable:$true] %s366_s29 }
   0x5   : > { %p3815_p6 = scmp.ne.s32.totalorder %s4392_s1, %s3814_s16  ;;  %p3821_p10 = scmp.lt.u32.totalorder %s3814_s16, %s4392_s1 }
   0x6   : > { %s4407_s27 = scalar_select %p3943_p2, 1, 0 }
   0x7   : > { %p3691_p4 = pneg %p3943_p2 }
   0x9   : > { %p3952_p5 = pnand %p4405_p3, %p3691_p4 }
   0xb   : > { %p3816_p7 = pneg %p3952_p5 }
   0xd   : > { %p3817_p8 = pnand %p3816_p7, %p3815_p6 }
   0xf   : > { %p3818_p9 = pneg %p3817_p8 }
  0x11   : > { %p3823_p11 = pnand %p3821_p10, %p3818_p9 }
  0x13   : > { %3826 = shalt.err (!%p3823_p11)
}
  0x14   : > { %s3827_s21 = scalar_lea.vmem %s367_s29, 128  ;;  %p3835_p1 = scmp.lt.s32.totalorder %s367_s29, %s367_s29 }
  0x15   : > { %p3828_p12 = scmp.ne.s32.totalorder %s367_s29, %s3827_s21  ;;  %p3836_p4 = scmp.lt.s32.totalorder %s3827_s21, %s3827_s21 }
  0x17   : > { %p3830_p13 = pnand %p3828_p12, %p3816_p7  ;;  %p3837_p3 = por %p3836_p4, %p3835_p1 }
  0x19   : > { %p3831_p0 = pneg %p3830_p13 }
  0x1b   : > { %p3838_p2 = pnand %p3837_p3, %p3831_p0 }
  0x1d   : > { %3841 = shalt.err (!%p3838_p2)
}
  0x1e   : > { %3694 = dma.hbm_to_vmem [thread:$0]  (!%p3952_p5), %s4392_s1, 128, %s367_s29, [#allocation3]  }
  0x1f   : > { %p4409_p6 = scmp.ne.s32.totalorder %s4407_s27, 0 }
  0x20   : > { %p4410_p8 = scmp.eq.s32.totalorder (!%p4409_p6), %s3939_s26, 0 }
  0x21   : > { %436 = sbr.rel (%p4409_p6) target bundleno = 7082 (0x1baa), region = 72 }
  0x28   : > { %3847 = dma.done.wait (%p4410_p8), [#allocation3], 128   ;;  %p4411_p7 = pmov %p4410_p8 }
  0x29   : > { %p495_p9 = scmp.lt.s32.totalorder %s3939_s26, 1  ;;  %vm536_vm0 = vcmask 64512   ;;  %v528_v0 = vld [vmem:[#allocation2] sm:$0xff]  ;;  %v667_v4 = vld [vmem:[%s4393_s2 + $0x8] sm:$0xff]  ;;  %v3855_v8 = vmov 0.0|0.0   ;;  %v668_v10 = vld [vmem:[%s4393_s2 + $0x10] sm:$0xff] }
  0x2a   : > { %3849 = vsyncadd (%p4411_p7), [#allocation3], 4294967168  ;;  %3661 = vmatprep.subr.mxu1 %v528_v0  ;;  %v666_v3 = vld [vmem:[%s4393_s2] sm:$0xff]  ;;  %3285 = vmatprep.subr.mxu0 %v528_v0  ;;  %v669_v11 = vld [vmem:[%s4393_s2 + $0x18] sm:$0xff]  ;;  %vm3856_vm1 = vmmov 0   ;;  %v3857_v14 = vmov 0.0  }
  0x2b   : > { %s4413_s26 = smov (!%p495_p9, %s3939_s26), 1  ;;  %3662 = vmatpush3.msra.mxu1 %v528_v0  ;;  %v3995_v6 = vpack.c.bf16 %v667_v4, %v666_v3  ;;  %v4012_v13 = vpack.c.bf16 %v669_v11, %v668_v10  ;;  %3286 = vmatpush3.msra.mxu0 %v528_v0  ;;  %vm681_vm2 = vcmask 261120   ;;  %v4043_v19 = vld [vmem:[%s4394_s3] ss:$0 sm:$0xff]  ;;  %s3858_s15 = smov 64   ;;  %v671_v41 = vld [vmem:[%s4395_s4 + $0x8] sm:$0xff] }
  0x2c   : > { %s3168_s24 = sshll.u32 %s4413_s26, 6  ;;  %s3998_s17 = sshll.u32 %s4413_s26, 3  ;;  %3538 = vmatprep.subr.bf16.mxu1 %v3855_v8  ;;  %3553 = vmatprep.subr.bf16.mxu0 %v3855_v8  ;;  %v670_v40 = vld [vmem:[%s4395_s4] sm:$0xff]  ;;  %v672_v45 = vld [vmem:[%s4395_s4 + $0x10] sm:$0xff]  ;;  %v673_v46 = vld [vmem:[%s4395_s4 + $0x18] sm:$0xff]  ;;  %vm866_vm3 = vcmask 130048  }
  0x2d   : > { %s3983_s14 = scalar_lea.vmem %s4391_s0, %s3168_s24  ;;  %s503_s23 = scalar_lea.vmem %s4400_s9, %s3998_s17  ;;  %v4067_v43 = vpack.c.bf16 %v671_v41, %v670_v40  ;;  %v4079_v47 = vpack.c.bf16 %v673_v46, %v672_v45  ;;  %v674_v53 = vld [vmem:[%s4396_s5] sm:$0xff]  ;;  %v675_v54 = vld [vmem:[%s4396_s5 + $0x8] sm:$0xff]  ;;  %vm2958_vm4 = vcmask 31744  }
  0x2e   : > { %v524_v1 = vld [vmem:[%s3983_s14 + $0x20] sm:$0xff]  ;;  %v525_v2 = vld [vmem:[%s3983_s14 + $0x28] sm:$0xff]  ;;  %v526_v5 = vld [vmem:[%s3983_s14 + $0x30] sm:$0xff]  ;;  %s507_s29 = scalar_lea.vmem %s4401_s10, %s3998_s17  ;;  %s3859_s16 = smov 32   ;;  %v4098_v55 = vpack.c.bf16 %v675_v54, %v674_v53 }
  0x2f   : > { %3293 = vmatprep.mubr.msk.f32.mxu1 %vm536_vm0, %v524_v1  ;;  %v520_v7 = vld [vmem:[%s3983_s14] sm:$0xff]  ;;  %v521_v9 = vld [vmem:[%s3983_s14 + $0x8] sm:$0xff]  ;;  %v527_v12 = vld [vmem:[%s3983_s14 + $0x38] sm:$0xff]  ;;  %s511_s19 = scalar_lea.vmem %s4402_s11, %s3998_s17  ;;  %s3860_s24 = smov 96  }
  0x30   : > { %3294 = vmatmul.mubr.msk.f32.vlgmr.msra.gmra.mrb[0].mxu1 %vm536_vm0, %v525_v2  ;;  %3287 = vmatprep.mubr.msk.f32.mxu0 %vm536_vm0, %v520_v7  ;;  %v677_v15 = vld [vmem:[%s503_s23] sm:$0xff]  ;;  %v522_v42 = vld [vmem:[%s3983_s14 + $0x10] sm:$0xff]  ;;  %v523_v44 = vld [vmem:[%s3983_s14 + $0x18] sm:$0xff]  ;;  %s515_s23 = scalar_lea.vmem %s4403_s12, %s3998_s17  ;;  %s3861_s14 = smov 16  }
  0x31   : > { %3540 = vmatpush3.bf16.msra.mxu1 %v3995_v6  ;;  %3296 = vmatprep.mubr.msk.f32.mxu1 %vm536_vm0, %v526_v5  ;;  %v678_v33 = vld [vmem:[%s507_s29] sm:$0xff]  ;;  %s3862_s28 = smov 80   ;;  %s519_s21 = scalar_lea.vmem %s4404_s13, %s3998_s17 }
  0x32   : > { %3541 = vmatprep.subr.bf16.mxu1 %v3855_v8  ;;  %3288 = vmatmul.mubr.msk.f32.vlgmr.msra.gmra.mrb[0].mxu0 %vm536_vm0, %v521_v9  ;;  %v679_v57 = vld [vmem:[%s511_s19] sm:$0xff] }
  0x33   : > { %3555 = vmatpush3.bf16.msra.mxu0 %v3995_v6  ;;  %3290 = vmatprep.mubr.msk.f32.mxu0 %vm536_vm0, %v522_v42  ;;  %v4128_v63 = vld [vmem:[%s4397_s6] ss:$0 sm:$0xff] }
  0x34   : > { %3297 = vmatmul.mubr.msk.f32.gmra.mrb[2].mxu1 %vm536_vm0, %v527_v12  ;;  %3556 = vmatprep.subr.bf16.mxu0 %v3855_v8 }
  0x35   : > { %3543 = vmatpush3.bf16.msra.mxu1 %v4012_v13  ;;  %3307 = vmatprep.mubr.msk.f32.mxu1 %vm3856_vm1, %v3857_v14 }
  0x36   : > { %3544 = vmatprep.subr.bf16.mxu1 %v3855_v8  ;;  %3291 = vmatmul.mubr.msk.f32.gmra.mrb[2].mxu0 %vm536_vm0, %v523_v44 }
  0x37   : > { %3558 = vmatpush3.bf16.msra.mxu0 %v4012_v13  ;;  %3336 = vmatprep.mubr.msk.f32.mxu0 %vm3856_vm1, %v3857_v14 }
  0x38   : > { %3308 = vmatmul.mubr.msk.f32.vlgmr.msra.gmra.mrb[4].mxu1 %vm681_vm2, %v677_v15  ;;  %3559 = vmatprep.subr.bf16.mxu0 %v3855_v8 }
  0x39   : > { %3318 = vmatprep.mubr.msk.f32.mxu1 %vm3856_vm1, %v3857_v14  ;;  %3546 = vmatpush3.bf16.msra.mxu1 %v4067_v43 }
  0x3a   : > { %3547 = vmatprep.subr.bf16.mxu1 %v3855_v8 }
  0x3d   : > { %3549 = vmatpush3.bf16.msra.mxu1 %v4079_v47 }
  0x3e   : > { %3550 = vmatprep.subr.bf16.mxu1 %v3855_v8 }
 0x103   : > { %v4034_v16 = vpop.f32.mrb[0].mxu1 }
 0x104   : > { %v4036_v17 = vpop.f32.mrb[1].mxu1 }
 0x105   : > { %v4038_v18 = vpop.f32.mrb[0].mxu0 }
 0x106   : > { %v627_v21 = vpop.f32.mrb[1].mxu0  ;;  %v633_v58 = vadd.f32 %v4038_v18, %v4043_v19 }
 0x107   : > { %v4045_v20 = vpop.f32.mrb[2].mxu1  ;;  %v628_v23 = vadd.f32 %v4043_v19, %v627_v21 }
 0x108   : > { %v4047_v22 = vpop.f32.mrb[3].mxu1 }
 0x109   : > { %v4088_v51 = vpop.f32.mrb[2].mxu0 }
 0x10a   : > { %v4090_v52 = vpop.f32.mrb[3].mxu0 }
 0x10b   : > { %v751_v24 = vpop.f32.mrb[4].mxu1  ;;  %v638_v44 = vadd.f32 %v4043_v19, %v4090_v52 }
 0x10c   : > { %v755_v25 = vadd.f32 %v751_v24, %v628_v23  ;;  %v3309_v26 = vpop.f32.mrb[5].mxu1  ;;  %v680_v23 = vld [vmem:[%s515_s23] sm:$0xff] }
 0x10e   : > { %v3108_v27 = vmul.f32 -1.442695, %v755_v25 }
 0x110   : > { %3714 = vpow2.f32 %v3108_v27 }
 0x11a   : > { %v3715_v28 = vpop.eup %3714 }
 0x11b   : > { %v759_v29 = vadd.f32 1.0, %v3715_v28 }
 0x11d   : > { %3716 = vrcp.f32 %v759_v29 }
 0x127   : > { %v3717_v30 = vpop.eup %3716 }
 0x128   : > { %v762_v31 = vmul.f32 2.0, %v3717_v30 }
 0x12a   : > { %v3109_v32 = vadd.f32 -1.0, %v762_v31 }
 0x12c   : > { %770 = vrot.lane.b32.xlu0 %v3109_v32, %s3858_s15 }
 0x130   : > { %765 = vrot.lane.b32.xlu0 %v678_v33, %s3859_s16 }
 0x19e   : > { %v771_v34 = vpop.permute.xlu0 %770 }
 0x19f   : > { %v773_v35 = vmul.f32 %v3717_v30, %v771_v34 }
 0x1a1   : > { %775 = vrot.lane.b32.xlu1 %v773_v35, %s3859_s16 }
 0x1a2   : > { %v766_v36 = vpop.permute.xlu0 %765 }
 0x1a3   : > { %v768_v37 = vmul.f32 %v3717_v30, %v766_v36 }
 0x213   : > { %v776_v38 = vpop.permute.xlu1 %775 }
 0x214   : > { %v4057_v39 = vadd.f32 %v776_v38, %v768_v37 }
 0x216   : > { %3718 = vtanh.f32 %v4057_v39 }
 0x220   : > { %v3719_v48 = vpop.eup %3718 }
 0x221   : > { %781 = vrot.lane.b32.xlu1 %v3719_v48, %s3858_s15 }
 0x293   : > { %v782_v49 = vpop.permute.xlu1 %781 }
 0x294   : > { %v784_v50 = vmul.f32 %v3717_v30, %v782_v49 }
 0x296   : > { %792 = vrot.lane.b32.xlu0 %v784_v50, %s3859_s16 }
 0x308   : > { %v793_v56 = vpop.permute.xlu0 %792 }
 0x309   : > { %3319 = vmatmul.mubr.msk.f32.vlgmr.msra.gmra.mrb[6].mxu1 %vm681_vm2, %v793_v56  ;;  %3337 = vmatmul.mubr.msk.f32.vlgmr.msra.gmra.mrb[4].mxu0 %vm681_vm2, %v793_v56 }
 0x30a   : > { %3552 = vmatpush3.bf16.msra.mxu1 %v4098_v55  ;;  %3325 = vmatprep.mubr.msk.f32.mxu1 %vm3856_vm1, %v3857_v14 }
 0x30b   : > { %3568 = vmatprep.subr.bf16.mxu1 %v3855_v8  ;;  %3561 = vmatpush3.bf16.msra.mxu0 %v4067_v43 }
 0x30c   : > { %3562 = vmatprep.subr.bf16.mxu0 %v3855_v8  ;;  %3347 = vmatprep.mubr.msk.f32.mxu0 %vm3856_vm1, %v3857_v14 }
 0x30f   : > { %3564 = vmatpush3.bf16.msra.mxu0 %v4079_v47 }
 0x310   : > { %3565 = vmatprep.subr.bf16.mxu0 %v3855_v8 }
 0x311   : > { %3326 = vmatmul.mubr.msk.f32.vlgmr.msra.gmra.mrb[6].mxu1 %vm866_vm3, %v679_v57 }
 0x312   : > { %3570 = vmatpush3.bf16.msra.mxu1 %v3995_v6  ;;  %3365 = vmatprep.mubr.msk.f32.mxu1 %vm3856_vm1, %v3857_v14 }
 0x313   : > { %3571 = vmatprep.subr.bf16.mxu1 %v3855_v8 }
 0x316   : > { %3573 = vmatpush3.bf16.msra.mxu1 %v4012_v13 }
 0x317   : > { %3574 = vmatprep.subr.bf16.mxu1 %v3855_v8 }
 0x3dc   : > { %v1036_v59 = vpop.f32.mrb[4].mxu0 }
 0x3dd   : > { %v1040_v60 = vadd.f32 %v1036_v59, %v633_v58  ;;  %v3338_v61 = vpop.f32.mrb[5].mxu0 }
 0x3df   : > { %v3116_v62 = vmul.f32 -1.442695, %v1040_v60 }
 0x3e1   : > { %3720 = vpow2.f32 %v3116_v62 }
 0x3e4   : > { %v936_v0 = vpop.f32.mrb[6].mxu1 }
 0x3e5   : > { %v3663_v1 = vadd.f32 %v4128_v63, %v936_v0  ;;  %v3327_v2 = vpop.f32.mrb[7].mxu1 }
 0x3e7   : > { %v3113_v3 = vmul.f32 -1.442695, %v3663_v1 }
 0x3e9   : > { %3722 = vpow2.f32 %v3113_v3 }
 0x3eb   : > { %v3721_v4 = vpop.eup %3720 }
 0x3ec   : > { %v1044_v5 = vadd.f32 1.0, %v3721_v4 }
 0x3ee   : > { %3724 = vrcp.f32 %v1044_v5 }
 0x3f3   : > { %v3723_v7 = vpop.eup %3722 }
 0x3f4   : > { %v944_v9 = vadd.f32 1.0, %v3723_v7 }
 0x3f6   : > { %3726 = vrcp.f32 %v944_v9 }
 0x3f8   : > { %v3725_v10 = vpop.eup %3724 }
 0x3f9   : > { %v1047_v11 = vmul.f32 2.0, %v3725_v10  ;;  %v1049_v28 = vmul.f32 %v3725_v10, %v4057_v39 }
 0x3fb   : > { %v3117_v12 = vadd.f32 -1.0, %v1047_v11 }
 0x3fd   : > { %1051 = vrot.lane.b32.xlu1 %v3117_v12, %s3858_s15 }
 0x400   : > { %v3727_v15 = vpop.eup %3726 }
 0x401   : > { %v947_v18 = vmul.f32 2.0, %v3727_v15 }
 0x403   : > { %v3114_v21 = vadd.f32 -1.0, %v947_v18 }
 0x405   : > { %955 = vrot.lane.b32.xlu0 %v3114_v21, %s3860_s24 }
 0x409   : > { %950 = vrot.lane.b32.xlu0 %v680_v23, %s3861_s14 }
 0x46f   : > { %v1052_v24 = vpop.permute.xlu1 %1051 }
 0x470   : > { %v1054_v25 = vmul.f32 %v3725_v10, %v1052_v24 }
 0x472   : > { %1056 = vrot.lane.b32.xlu1 %v1054_v25, %s3859_s16 }
 0x477   : > { %v956_v26 = vpop.permute.xlu0 %955 }
 0x478   : > { %v958_v27 = vmul.f32 %v3727_v15, %v956_v26 }
 0x47a   : > { %960 = vrot.lane.b32.xlu1 %v958_v27, %s3861_s14 }
 0x47b   : > { %v951_v31 = vpop.permute.xlu0 %950 }
 0x47c   : > { %v953_v32 = vmul.f32 %v3727_v15, %v951_v31 }
 0x4e4   : > { %v1057_v29 = vpop.permute.xlu1 %1056 }
 0x4e5   : > { %v4141_v30 = vadd.f32 %v1057_v29, %v1049_v28 }
 0x4e7   : > { %3728 = vtanh.f32 %v4141_v30 }
 0x4ec   : > { %v961_v33 = vpop.permute.xlu1 %960 }
 0x4ed   : > { %v4144_v34 = vadd.f32 %v961_v33, %v953_v32 }
 0x4ef   : > { %3730 = vtanh.f32 %v4144_v34 }
 0x4f1   : > { %v3729_v35 = vpop.eup %3728 }
 0x4f2   : > { %1062 = vrot.lane.b32.xlu0 %v3729_v35, %s3858_s15 }
 0x4f9   : > { %v3731_v36 = vpop.eup %3730 }
 0x4fa   : > { %966 = vrot.lane.b32.xlu1 %v3731_v36, %s3859_s16 }
 0x564   : > { %v1063_v37 = vpop.permute.xlu0 %1062 }
 0x565   : > { %v1065_v38 = vmul.f32 %v3725_v10, %v1063_v37 }
 0x567   : > { %1067 = vrot.lane.b32.xlu0 %v1065_v38, %s3859_s16 }
 0x56c   : > { %v967_v39 = vpop.permute.xlu1 %966 }
 0x56d   : > { %v969_v40 = vmul.f32 %v3727_v15, %v967_v39 }
 0x56f   : > { %1142 = vrot.lane.b32.xlu1 %v969_v40, %s3862_s28 }
 0x5d9   : > { %v1068_v41 = vpop.permute.xlu0 %1067 }
 0x5da   : > { %3348 = vmatmul.mubr.msk.f32.vlgmr.msra.gmra.mrb[6].mxu0 %vm681_vm2, %v1068_v41  ;;  %3366 = vmatmul.mubr.msk.f32.vlgmr.msra.gmra.mrb[8].mxu1 %vm681_vm2, %v1068_v41 }
 0x5db   : > { %3567 = vmatpush3.bf16.msra.mxu0 %v4098_v55  ;;  %3354 = vmatprep.mubr.msk.f32.mxu0 %vm3856_vm1, %v3857_v14 }
 0x5dc   : > { %3583 = vmatprep.subr.bf16.mxu0 %v3855_v8  ;;  %3576 = vmatpush3.bf16.msra.mxu1 %v4067_v43 }
 0x5dd   : > { %3577 = vmatprep.subr.bf16.mxu1 %v3855_v8  ;;  %3376 = vmatprep.mubr.msk.f32.mxu1 %vm3856_vm1, %v3857_v14 }
 0x5e0   : > { %3579 = vmatpush3.bf16.msra.mxu1 %v4079_v47 }
 0x5e1   : > { %v1143_v42 = vpop.permute.xlu1 %1142  ;;  %3580 = vmatprep.subr.bf16.mxu1 %v3855_v8 }
 0x5e2   : > { %3355 = vmatmul.mubr.msk.f32.vlgmr.msra.gmra.mrb[6].mxu0 %vm866_vm3, %v1143_v42 }
 0x5e3   : > { %3585 = vmatpush3.bf16.msra.mxu0 %v3995_v6  ;;  %3394 = vmatprep.mubr.msk.f32.mxu0 %vm3856_vm1, %v3857_v14 }
 0x5e4   : > { %3586 = vmatprep.subr.bf16.mxu0 %v3855_v8 }
 0x5e7   : > { %3588 = vmatpush3.bf16.msra.mxu0 %v4012_v13 }
 0x5e8   : > { %3589 = vmatprep.subr.bf16.mxu0 %v3855_v8 }
 0x6ad   : > { %v1308_v45 = vpop.f32.mrb[8].mxu1 }
 0x6ae   : > { %v1312_v46 = vadd.f32 %v1308_v45, %v638_v44  ;;  %v3367_v48 = vpop.f32.mrb[9].mxu1 }
 0x6b0   : > { %v3123_v49 = vmul.f32 -1.442695, %v1312_v46 }
 0x6b2   : > { %3732 = vpow2.f32 %v3123_v49 }
 0x6b5   : > { %v1212_v50 = vpop.f32.mrb[6].mxu0 }
 0x6b6   : > { %v3664_v53 = vadd.f32 %v4128_v63, %v1212_v50  ;;  %v3356_v54 = vpop.f32.mrb[7].mxu0 }
 0x6b8   : > { %v3120_v56 = vmul.f32 -1.442695, %v3664_v53 }
 0x6ba   : > { %3734 = vpow2.f32 %v3120_v56 }
 0x6bc   : > { %v3733_v57 = vpop.eup %3732 }
 0x6bd   : > { %v1316_v58 = vadd.f32 1.0, %v3733_v57 }
 0x6bf   : > { %3736 = vrcp.f32 %v1316_v58 }
 0x6c4   : > { %v3735_v59 = vpop.eup %3734 }
 0x6c5   : > { %v1220_v60 = vadd.f32 1.0, %v3735_v59 }
 0x6c7   : > { %3738 = vrcp.f32 %v1220_v60 }
 0x6c9   : > { %v3737_v61 = vpop.eup %3736 }
 0x6ca   : > { %v1319_v62 = vmul.f32 2.0, %v3737_v61  ;;  %v1321_v9 = vmul.f32 %v3737_v61, %v4141_v30  ;;  %v643_v30 = vadd.f32 %v4088_v51, %v4043_v19 }
 0x6cc   : > { %v3124_v52 = vadd.f32 -1.0, %v1319_v62 }
 0x6ce   : > { %1323 = vrot.lane.b32.xlu0 %v3124_v52, %s3858_s15 }
 0x6d1   : > { %v3739_v0 = vpop.eup %3738 }
 0x6d2   : > { %v1223_v1 = vmul.f32 2.0, %v3739_v0  ;;  %v1225_v12 = vmul.f32 %v3739_v0, %v4144_v34 }
 0x6d4   : > { %v3121_v2 = vadd.f32 -1.0, %v1223_v1 }
 0x6d6   : > { %1227 = vrot.lane.b32.xlu1 %v3121_v2, %s3860_s24 }
 0x740   : > { %v1324_v3 = vpop.permute.xlu0 %1323 }
 0x741   : > { %v1326_v4 = vmul.f32 %v3737_v61, %v1324_v3 }
 0x743   : > { %1328 = vrot.lane.b32.xlu0 %v1326_v4, %s3859_s16 }
 0x748   : > { %v1228_v5 = vpop.permute.xlu1 %1227 }
 0x749   : > { %v1230_v7 = vmul.f32 %v3739_v0, %v1228_v5 }
 0x74b   : > { %1232 = vrot.lane.b32.xlu1 %v1230_v7, %s3861_s14 }
 0x7b5   : > { %v1329_v10 = vpop.permute.xlu0 %1328 }
 0x7b6   : > { %v4178_v11 = vadd.f32 %v1329_v10, %v1321_v9  ;;  %v648_v9 = vadd.f32 %v4043_v19, %v4036_v17 }
 0x7b8   : > { %3740 = vtanh.f32 %v4178_v11 }
 0x7bd   : > { %v1233_v15 = vpop.permute.xlu1 %1232 }
 0x7be   : > { %v4182_v18 = vadd.f32 %v1233_v15, %v1225_v12 }
 0x7c0   : > { %3742 = vtanh.f32 %v4182_v18 }
 0x7c2   : > { %v3741_v21 = vpop.eup %3740 }
 0x7c3   : > { %1334 = vrot.lane.b32.xlu0 %v3741_v21, %s3858_s15 }
 0x7ca   : > { %v3743_v23 = vpop.eup %3742 }
 0x7cb   : > { %1238 = vrot.lane.b32.xlu1 %v3743_v23, %s3859_s16 }
 0x835   : > { %v1335_v24 = vpop.permute.xlu0 %1334 }
 0x836   : > { %v1337_v25 = vmul.f32 %v3737_v61, %v1335_v24 }
 0x838   : > { %1339 = vrot.lane.b32.xlu0 %v1337_v25, %s3859_s16 }
 0x83d   : > { %v1239_v26 = vpop.permute.xlu1 %1238 }
 0x83e   : > { %v1241_v27 = vmul.f32 %v3739_v0, %v1239_v26 }
 0x840   : > { %1414 = vrot.lane.b32.xlu1 %v1241_v27, %s3862_s28 }
 0x8aa   : > { %v1340_v28 = vpop.permute.xlu0 %1339 }
 0x8ab   : > { %3377 = vmatmul.mubr.msk.f32.vlgmr.msra.gmra.mrb[10].mxu1 %vm681_vm2, %v1340_v28  ;;  %3395 = vmatmul.mubr.msk.f32.vlgmr.msra.gmra.mrb[8].mxu0 %vm681_vm2, %v1340_v28 }
 0x8ac   : > { %3582 = vmatpush3.bf16.msra.mxu1 %v4098_v55  ;;  %3383 = vmatprep.mubr.msk.f32.mxu1 %vm3856_vm1, %v3857_v14 }
 0x8ad   : > { %3598 = vmatprep.subr.bf16.mxu1 %v3855_v8  ;;  %3591 = vmatpush3.bf16.msra.mxu0 %v4067_v43 }
 0x8ae   : > { %3592 = vmatprep.subr.bf16.mxu0 %v3855_v8  ;;  %3405 = vmatprep.mubr.msk.f32.mxu0 %vm3856_vm1, %v3857_v14 }
 0x8b1   : > { %3594 = vmatpush3.bf16.msra.mxu0 %v4079_v47 }
 0x8b2   : > { %v1415_v29 = vpop.permute.xlu1 %1414  ;;  %3595 = vmatprep.subr.bf16.mxu0 %v3855_v8 }
 0x8b3   : > { %3384 = vmatmul.mubr.msk.f32.vlgmr.msra.gmra.mrb[10].mxu1 %vm866_vm3, %v1415_v29 }
 0x8b4   : > { %3600 = vmatpush3.bf16.msra.mxu1 %v3995_v6  ;;  %3423 = vmatprep.mubr.msk.f32.mxu1 %vm3856_vm1, %v3857_v14 }
 0x8b5   : > { %3601 = vmatprep.subr.bf16.mxu1 %v3855_v8 }
 0x8b8   : > { %3603 = vmatpush3.bf16.msra.mxu1 %v4012_v13 }
 0x8b9   : > { %3604 = vmatprep.subr.bf16.mxu1 %v3855_v8 }
 0x97e   : > { %v1580_v31 = vpop.f32.mrb[8].mxu0 }
 0x97f   : > { %v1584_v32 = vadd.f32 %v1580_v31, %v643_v30  ;;  %v3396_v33 = vpop.f32.mrb[9].mxu0 }
 0x981   : > { %v3130_v34 = vmul.f32 -1.442695, %v1584_v32 }
 0x983   : > { %3744 = vpow2.f32 %v3130_v34 }
 0x986   : > { %v1484_v35 = vpop.f32.mrb[10].mxu1 }
 0x987   : > { %v3665_v36 = vadd.f32 %v4128_v63, %v1484_v35  ;;  %v3385_v37 = vpop.f32.mrb[11].mxu1 }
 0x989   : > { %v3127_v38 = vmul.f32 -1.442695, %v3665_v36 }
 0x98b   : > { %3746 = vpow2.f32 %v3127_v38 }
 0x98d   : > { %v3745_v39 = vpop.eup %3744 }
 0x98e   : > { %v1588_v40 = vadd.f32 1.0, %v3745_v39 }
 0x990   : > { %3748 = vrcp.f32 %v1588_v40 }
 0x995   : > { %v3747_v41 = vpop.eup %3746 }
 0x996   : > { %v1492_v42 = vadd.f32 1.0, %v3747_v41 }
 0x998   : > { %3750 = vrcp.f32 %v1492_v42 }
 0x99a   : > { %v3749_v44 = vpop.eup %3748 }
 0x99b   : > { %v1591_v45 = vmul.f32 2.0, %v3749_v44  ;;  %v1593_v57 = vmul.f32 %v3749_v44, %v4178_v11 }
 0x99d   : > { %v3131_v51 = vadd.f32 -1.0, %v1591_v45 }
 0x99f   : > { %1595 = vrot.lane.b32.xlu0 %v3131_v51, %s3858_s15 }
 0x9a2   : > { %v3751_v46 = vpop.eup %3750 }
 0x9a3   : > { %v1495_v48 = vmul.f32 2.0, %v3751_v46  ;;  %v1497_v60 = vmul.f32 %v3751_v46, %v4182_v18 }
 0x9a5   : > { %v3128_v49 = vadd.f32 -1.0, %v1495_v48 }
 0x9a7   : > { %1499 = vrot.lane.b32.xlu1 %v3128_v49, %s3860_s24 }
 0xa11   : > { %v1596_v50 = vpop.permute.xlu0 %1595 }
 0xa12   : > { %v1598_v53 = vmul.f32 %v3749_v44, %v1596_v50 }
 0xa14   : > { %1600 = vrot.lane.b32.xlu0 %v1598_v53, %s3859_s16 }
 0xa19   : > { %v1500_v54 = vpop.permute.xlu1 %1499 }
 0xa1a   : > { %v1502_v56 = vmul.f32 %v3751_v46, %v1500_v54 }
 0xa1c   : > { %1504 = vrot.lane.b32.xlu1 %v1502_v56, %s3861_s14  ;;  %v653_v56 = vadd.f32 %v4034_v16, %v4043_v19 }
 0xa86   : > { %v1601_v58 = vpop.permute.xlu0 %1600 }
 0xa87   : > { %v4216_v59 = vadd.f32 %v1601_v58, %v1593_v57 }
 0xa89   : > { %3752 = vtanh.f32 %v4216_v59 }
 0xa8e   : > { %v1505_v61 = vpop.permute.xlu1 %1504 }
 0xa8f   : > { %v4220_v62 = vadd.f32 %v1505_v61, %v1497_v60 }
 0xa91   : > { %3754 = vtanh.f32 %v4220_v62 }
 0xa93   : > { %v3753_v52 = vpop.eup %3752 }
 0xa94   : > { %1606 = vrot.lane.b32.xlu0 %v3753_v52, %s3858_s15 }
 0xa9b   : > { %v3755_v0 = vpop.eup %3754 }
 0xa9c   : > { %1510 = vrot.lane.b32.xlu1 %v3755_v0, %s3859_s16 }
 0xb06   : > { %v1607_v1 = vpop.permute.xlu0 %1606 }
 0xb07   : > { %v1609_v2 = vmul.f32 %v3749_v44, %v1607_v1 }
 0xb09   : > { %1611 = vrot.lane.b32.xlu0 %v1609_v2, %s3859_s16 }
 0xb0e   : > { %v1511_v3 = vpop.permute.xlu1 %1510 }
 0xb0f   : > { %v1513_v4 = vmul.f32 %v3751_v46, %v1511_v3 }
 0xb11   : > { %1686 = vrot.lane.b32.xlu1 %v1513_v4, %s3862_s28 }
 0xb7b   : > { %v1612_v5 = vpop.permute.xlu0 %1611 }
 0xb7c   : > { %3406 = vmatmul.mubr.msk.f32.vlgmr.msra.gmra.mrb[10].mxu0 %vm681_vm2, %v1612_v5  ;;  %3424 = vmatmul.mubr.msk.f32.vlgmr.msra.gmra.mrb[12].mxu1 %vm681_vm2, %v1612_v5 }
 0xb7d   : > { %3597 = vmatpush3.bf16.msra.mxu0 %v4098_v55  ;;  %3412 = vmatprep.mubr.msk.f32.mxu0 %vm3856_vm1, %v3857_v14 }
 0xb7e   : > { %3613 = vmatprep.subr.bf16.mxu0 %v3855_v8  ;;  %3606 = vmatpush3.bf16.msra.mxu1 %v4067_v43 }
 0xb7f   : > { %3607 = vmatprep.subr.bf16.mxu1 %v3855_v8  ;;  %3434 = vmatprep.mubr.msk.f32.mxu1 %vm3856_vm1, %v3857_v14 }
 0xb82   : > { %3609 = vmatpush3.bf16.msra.mxu1 %v4079_v47 }
 0xb83   : > { %v1687_v7 = vpop.permute.xlu1 %1686  ;;  %3610 = vmatprep.subr.bf16.mxu1 %v3855_v8 }
 0xb84   : > { %3413 = vmatmul.mubr.msk.f32.vlgmr.msra.gmra.mrb[10].mxu0 %vm866_vm3, %v1687_v7 }
 0xb85   : > { %3615 = vmatpush3.bf16.msra.mxu0 %v3995_v6  ;;  %3452 = vmatprep.mubr.msk.f32.mxu0 %vm3856_vm1, %v3857_v14 }
 0xb86   : > { %3616 = vmatprep.subr.bf16.mxu0 %v3855_v8 }
 0xb89   : > { %3618 = vmatpush3.bf16.msra.mxu0 %v4012_v13 }
 0xb8a   : > { %3619 = vmatprep.subr.bf16.mxu0 %v3855_v8 }
 0xc4f   : > { %v1852_v10 = vpop.f32.mrb[12].mxu1 }
 0xc50   : > { %v1856_v11 = vadd.f32 %v1852_v10, %v648_v9  ;;  %v3425_v12 = vpop.f32.mrb[13].mxu1 }
 0xc52   : > { %v3137_v15 = vmul.f32 -1.442695, %v1856_v11 }
 0xc54   : > { %3756 = vpow2.f32 %v3137_v15 }
 0xc57   : > { %v1756_v18 = vpop.f32.mrb[10].mxu0 }
 0xc58   : > { %v3666_v21 = vadd.f32 %v4128_v63, %v1756_v18  ;;  %v3414_v23 = vpop.f32.mrb[11].mxu0 }
 0xc5a   : > { %v3134_v24 = vmul.f32 -1.442695, %v3666_v21 }
 0xc5c   : > { %3758 = vpow2.f32 %v3134_v24 }
 0xc5e   : > { %v3757_v25 = vpop.eup %3756 }
 0xc5f   : > { %v1860_v26 = vadd.f32 1.0, %v3757_v25 }
 0xc61   : > { %3760 = vrcp.f32 %v1860_v26 }
 0xc66   : > { %v3759_v27 = vpop.eup %3758 }
 0xc67   : > { %v1764_v28 = vadd.f32 1.0, %v3759_v27 }
 0xc69   : > { %3762 = vrcp.f32 %v1764_v28 }
 0xc6b   : > { %v3761_v29 = vpop.eup %3760 }
 0xc6c   : > { %v1863_v30 = vmul.f32 2.0, %v3761_v29  ;;  %v1865_v38 = vmul.f32 %v3761_v29, %v4216_v59 }
 0xc6e   : > { %v3138_v17 = vadd.f32 -1.0, %v1863_v30 }
 0xc70   : > { %1867 = vrot.lane.b32.xlu0 %v3138_v17, %s3858_s15 }
 0xc73   : > { %v3763_v31 = vpop.eup %3762 }
 0xc74   : > { %v1767_v32 = vmul.f32 2.0, %v3763_v31  ;;  %v1769_v41 = vmul.f32 %v3763_v31, %v4220_v62 }
 0xc76   : > { %v3135_v33 = vadd.f32 -1.0, %v1767_v32 }
 0xc78   : > { %1771 = vrot.lane.b32.xlu1 %v3135_v33, %s3860_s24 }
 0xce2   : > { %v1868_v34 = vpop.permute.xlu0 %1867 }
 0xce3   : > { %v1870_v35 = vmul.f32 %v3761_v29, %v1868_v34 }
 0xce5   : > { %1872 = vrot.lane.b32.xlu0 %v1870_v35, %s3859_s16 }
 0xcea   : > { %v1772_v36 = vpop.permute.xlu1 %1771 }
 0xceb   : > { %v1774_v37 = vmul.f32 %v3763_v31, %v1772_v36  ;;  %v658_v36 = vadd.f32 %v4043_v19, %v4047_v22 }
 0xced   : > { %1776 = vrot.lane.b32.xlu1 %v1774_v37, %s3861_s14 }
 0xd57   : > { %v1873_v39 = vpop.permute.xlu0 %1872 }
 0xd58   : > { %v4254_v40 = vadd.f32 %v1873_v39, %v1865_v38 }
 0xd5a   : > { %3764 = vtanh.f32 %v4254_v40 }
 0xd5f   : > { %v1777_v42 = vpop.permute.xlu1 %1776 }
 0xd60   : > { %v4258_v44 = vadd.f32 %v1777_v42, %v1769_v41 }
 0xd62   : > { %3766 = vtanh.f32 %v4258_v44 }
 0xd64   : > { %v3765_v45 = vpop.eup %3764 }
 0xd65   : > { %1878 = vrot.lane.b32.xlu0 %v3765_v45, %s3858_s15 }
 0xd6c   : > { %v3767_v51 = vpop.eup %3766 }
 0xd6d   : > { %1782 = vrot.lane.b32.xlu1 %v3767_v51, %s3859_s16 }
 0xdd7   : > { %v1879_v46 = vpop.permute.xlu0 %1878 }
 0xdd8   : > { %v1881_v48 = vmul.f32 %v3761_v29, %v1879_v46 }
 0xdda   : > { %1883 = vrot.lane.b32.xlu0 %v1881_v48, %s3859_s16 }
 0xddf   : > { %v1783_v49 = vpop.permute.xlu1 %1782 }
 0xde0   : > { %v1785_v50 = vmul.f32 %v3763_v31, %v1783_v49 }
 0xde2   : > { %1958 = vrot.lane.b32.xlu1 %v1785_v50, %s3862_s28 }
 0xe4c   : > { %v1884_v53 = vpop.permute.xlu0 %1883 }
 0xe4d   : > { %3435 = vmatmul.mubr.msk.f32.vlgmr.msra.gmra.mrb[14].mxu1 %vm681_vm2, %v1884_v53  ;;  %3453 = vmatmul.mubr.msk.f32.vlgmr.msra.gmra.mrb[12].mxu0 %vm681_vm2, %v1884_v53 }
 0xe4e   : > { %3612 = vmatpush3.bf16.msra.mxu1 %v4098_v55  ;;  %3441 = vmatprep.mubr.msk.f32.mxu1 %vm3856_vm1, %v3857_v14 }
 0xe4f   : > { %3628 = vmatprep.subr.bf16.mxu1 %v3855_v8  ;;  %3621 = vmatpush3.bf16.msra.mxu0 %v4067_v43 }
 0xe50   : > { %3622 = vmatprep.subr.bf16.mxu0 %v3855_v8  ;;  %3463 = vmatprep.mubr.msk.f32.mxu0 %vm3856_vm1, %v3857_v14 }
 0xe53   : > { %3624 = vmatpush3.bf16.msra.mxu0 %v4079_v47 }
 0xe54   : > { %v1959_v54 = vpop.permute.xlu1 %1958  ;;  %3625 = vmatprep.subr.bf16.mxu0 %v3855_v8 }
 0xe55   : > { %3442 = vmatmul.mubr.msk.f32.vlgmr.msra.gmra.mrb[14].mxu1 %vm866_vm3, %v1959_v54 }
 0xe56   : > { %3630 = vmatpush3.bf16.msra.mxu1 %v3995_v6  ;;  %3481 = vmatprep.mubr.msk.f32.mxu1 %vm3856_vm1, %v3857_v14 }
 0xe57   : > { %3631 = vmatprep.subr.bf16.mxu1 %v3855_v8 }
 0xe5a   : > { %3633 = vmatpush3.bf16.msra.mxu1 %v4012_v13 }
 0xe5b   : > { %3634 = vmatprep.subr.bf16.mxu1 %v3855_v8 }
 0xf20   : > { %v2124_v57 = vpop.f32.mrb[12].mxu0 }
 0xf21   : > { %v2128_v58 = vadd.f32 %v2124_v57, %v653_v56  ;;  %v3454_v59 = vpop.f32.mrb[13].mxu0 }
 0xf23   : > { %v3144_v60 = vmul.f32 -1.442695, %v2128_v58 }
 0xf25   : > { %3768 = vpow2.f32 %v3144_v60 }
 0xf28   : > { %v2028_v61 = vpop.f32.mrb[14].mxu1 }
 0xf29   : > { %v3667_v62 = vadd.f32 %v4128_v63, %v2028_v61  ;;  %v3443_v52 = vpop.f32.mrb[15].mxu1 }
 0xf2b   : > { %v3141_v0 = vmul.f32 -1.442695, %v3667_v62 }
 0xf2d   : > { %3770 = vpow2.f32 %v3141_v0 }
 0xf2f   : > { %v3769_v1 = vpop.eup %3768 }
 0xf30   : > { %v2132_v2 = vadd.f32 1.0, %v3769_v1 }
 0xf32   : > { %3772 = vrcp.f32 %v2132_v2 }
 0xf37   : > { %v3771_v3 = vpop.eup %3770 }
 0xf38   : > { %v2036_v4 = vadd.f32 1.0, %v3771_v3 }
 0xf3a   : > { %3774 = vrcp.f32 %v2036_v4 }
 0xf3c   : > { %v3773_v5 = vpop.eup %3772 }
 0xf3d   : > { %v2135_v7 = vmul.f32 2.0, %v3773_v5  ;;  %v2137_v23 = vmul.f32 %v3773_v5, %v4254_v40 }
 0xf3f   : > { %v3145_v16 = vadd.f32 -1.0, %v2135_v7 }
 0xf41   : > { %2139 = vrot.lane.b32.xlu0 %v3145_v16, %s3858_s15 }
 0xf44   : > { %v3775_v9 = vpop.eup %3774 }
 0xf45   : > { %v2039_v10 = vmul.f32 2.0, %v3775_v9  ;;  %v2041_v26 = vmul.f32 %v3775_v9, %v4258_v44 }
 0xf47   : > { %v3142_v11 = vadd.f32 -1.0, %v2039_v10 }
 0xf49   : > { %2043 = vrot.lane.b32.xlu1 %v3142_v11, %s3860_s24 }
 0xfb3   : > { %v2140_v12 = vpop.permute.xlu0 %2139 }
 0xfb4   : > { %v2142_v15 = vmul.f32 %v3773_v5, %v2140_v12 }
 0xfb6   : > { %2144 = vrot.lane.b32.xlu0 %v2142_v15, %s3859_s16 }
 0xfbb   : > { %v2044_v18 = vpop.permute.xlu1 %2043 }
 0xfbc   : > { %v2046_v21 = vmul.f32 %v3775_v9, %v2044_v18 }
 0xfbe   : > { %2048 = vrot.lane.b32.xlu1 %v2046_v21, %s3861_s14 }
0x1028   : > { %v2145_v24 = vpop.permute.xlu0 %2144 }
0x1029   : > { %v4292_v25 = vadd.f32 %v2145_v24, %v2137_v23 }
0x102b   : > { %3776 = vtanh.f32 %v4292_v25 }
0x1030   : > { %v2049_v27 = vpop.permute.xlu1 %2048 }
0x1031   : > { %v4296_v28 = vadd.f32 %v2049_v27, %v2041_v26 }
0x1033   : > { %3778 = vtanh.f32 %v4296_v28 }
0x1035   : > { %v3777_v29 = vpop.eup %3776 }
0x1036   : > { %2150 = vrot.lane.b32.xlu0 %v3777_v29, %s3858_s15 }
0x103d   : > { %v3779_v30 = vpop.eup %3778 }
0x103e   : > { %2054 = vrot.lane.b32.xlu1 %v3779_v30, %s3859_s16 }
0x10a8   : > { %v2151_v17 = vpop.permute.xlu0 %2150 }
0x10a9   : > { %v2153_v31 = vmul.f32 %v3773_v5, %v2151_v17 }
0x10ab   : > { %2155 = vrot.lane.b32.xlu0 %v2153_v31, %s3859_s16 }
0x10b0   : > { %v2055_v32 = vpop.permute.xlu1 %2054 }
0x10b1   : > { %v2057_v33 = vmul.f32 %v3775_v9, %v2055_v32 }
0x10b3   : > { %2230 = vrot.lane.b32.xlu1 %v2057_v33, %s3862_s28 }
0x111d   : > { %v2156_v34 = vpop.permute.xlu0 %2155 }
0x111e   : > { %3464 = vmatmul.mubr.msk.f32.vlgmr.msra.gmra.mrb[14].mxu0 %vm681_vm2, %v2156_v34  ;;  %3482 = vmatmul.mubr.msk.f32.vlgmr.msra.gmra.mrb[16].mxu1 %vm681_vm2, %v2156_v34 }
0x111f   : > { %3627 = vmatpush3.bf16.msra.mxu0 %v4098_v55  ;;  %3470 = vmatprep.mubr.msk.f32.mxu0 %vm3856_vm1, %v3857_v14 }
0x1120   : > { %3643 = vmatprep.subr.bf16.mxu0 %v3855_v8  ;;  %3636 = vmatpush3.bf16.msra.mxu1 %v4067_v43 }
0x1121   : > { %3637 = vmatprep.subr.bf16.mxu1 %v3855_v8  ;;  %3492 = vmatprep.mubr.msk.f32.mxu1 %vm3856_vm1, %v3857_v14 }
0x1124   : > { %3639 = vmatpush3.bf16.msra.mxu1 %v4079_v47 }
0x1125   : > { %v2231_v35 = vpop.permute.xlu1 %2230  ;;  %3640 = vmatprep.subr.bf16.mxu1 %v3855_v8 }
0x1126   : > { %3471 = vmatmul.mubr.msk.f32.vlgmr.msra.gmra.mrb[14].mxu0 %vm866_vm3, %v2231_v35 }
0x1127   : > { %3645 = vmatpush3.bf16.msra.mxu0 %v3995_v6  ;;  %3510 = vmatprep.mubr.msk.f32.mxu0 %vm3856_vm1, %v3857_v14 }
0x1128   : > { %3646 = vmatprep.subr.bf16.mxu0 %v3855_v8 }
0x112b   : > { %3648 = vmatpush3.bf16.msra.mxu0 %v4012_v13 }
0x112c   : > { %3649 = vmatprep.subr.bf16.mxu0 %v3855_v8 }
0x11f1   : > { %v2396_v37 = vpop.f32.mrb[16].mxu1 }
0x11f2   : > { %v2400_v38 = vadd.f32 %v2396_v37, %v658_v36  ;;  %v3483_v39 = vpop.f32.mrb[17].mxu1 }
0x11f4   : > { %v3151_v40 = vmul.f32 -1.442695, %v2400_v38 }
0x11f6   : > { %3780 = vpow2.f32 %v3151_v40 }
0x11f9   : > { %v2300_v41 = vpop.f32.mrb[14].mxu0 }
0x11fa   : > { %v3668_v6 = vadd.f32 %v4128_v63, %v2300_v41  ;;  %v3472_v42 = vpop.f32.mrb[15].mxu0 }
0x11fc   : > { %v3148_v44 = vmul.f32 -1.442695, %v3668_v6 }
0x11fe   : > { %3782 = vpow2.f32 %v3148_v44 }
0x1200   : > { %v3781_v45 = vpop.eup %3780 }
0x1201   : > { %v2404_v51 = vadd.f32 1.0, %v3781_v45 }
0x1203   : > { %3784 = vrcp.f32 %v2404_v51 }
0x1208   : > { %v3783_v13 = vpop.eup %3782 }
0x1209   : > { %v2308_v46 = vadd.f32 1.0, %v3783_v13 }
0x120b   : > { %3786 = vrcp.f32 %v2308_v46 }
0x120d   : > { %v3785_v48 = vpop.eup %3784 }
0x120e   : > { %v2407_v49 = vmul.f32 2.0, %v3785_v48  ;;  %v2409_v60 = vmul.f32 %v3785_v48, %v4292_v25 }
0x1210   : > { %v3152_v22 = vadd.f32 -1.0, %v2407_v49 }
0x1212   : > { %2411 = vrot.lane.b32.xlu0 %v3152_v22, %s3858_s15 }
0x1215   : > { %v3787_v50 = vpop.eup %3786 }
0x1216   : > { %v2311_v53 = vmul.f32 2.0, %v3787_v50  ;;  %v2313_v52 = vmul.f32 %v3787_v50, %v4296_v28 }
0x1218   : > { %v3149_v54 = vadd.f32 -1.0, %v2311_v53 }
0x121a   : > { %2315 = vrot.lane.b32.xlu1 %v3149_v54, %s3860_s24 }
0x1284   : > { %v2412_v56 = vpop.permute.xlu0 %2411 }
0x1285   : > { %v2414_v57 = vmul.f32 %v3785_v48, %v2412_v56 }
0x1287   : > { %2416 = vrot.lane.b32.xlu0 %v2414_v57, %s3859_s16 }
0x128c   : > { %v2316_v58 = vpop.permute.xlu1 %2315 }
0x128d   : > { %v2318_v59 = vmul.f32 %v3787_v50, %v2316_v58 }
0x128f   : > { %2320 = vrot.lane.b32.xlu1 %v2318_v59, %s3861_s14 }
0x12f9   : > { %v2417_v61 = vpop.permute.xlu0 %2416 }
0x12fa   : > { %v2419_v62 = vadd.f32 %v2417_v61, %v2409_v60 }
0x12fc   : > { %3788 = vtanh.f32 %v2419_v62 }
0x1301   : > { %v2321_v0 = vpop.permute.xlu1 %2320 }
0x1302   : > { %v2323_v1 = vadd.f32 %v2321_v0, %v2313_v52 }
0x1304   : > { %3790 = vtanh.f32 %v2323_v1 }
0x1306   : > { %v3789_v2 = vpop.eup %3788 }
0x1307   : > { %2422 = vrot.lane.b32.xlu0 %v3789_v2, %s3858_s15 }
0x130e   : > { %v3791_v3 = vpop.eup %3790 }
0x130f   : > { %2326 = vrot.lane.b32.xlu1 %v3791_v3, %s3859_s16 }
0x1379   : > { %v2423_v4 = vpop.permute.xlu0 %2422 }
0x137a   : > { %v2425_v5 = vmul.f32 %v3785_v48, %v2423_v4  ;;  %v3164_v4 = vld [vmem:[%s4399_s8] ss:$0 sm:$0xff] }
0x137c   : > { %2427 = vrot.lane.b32.xlu0 %v2425_v5, %s3859_s16 }
0x1381   : > { %v2327_v7 = vpop.permute.xlu1 %2326 }
0x1382   : > { %v2329_v16 = vmul.f32 %v3787_v50, %v2327_v7 }
0x1384   : > { %2502 = vrot.lane.b32.xlu1 %v2329_v16, %s3862_s28 }
0x13ee   : > { %v2428_v9 = vpop.permute.xlu0 %2427 }
0x13ef   : > { %3493 = vmatmul.mubr.msk.f32.vlgmr.msra.gmra.mrb[18].mxu1 %vm681_vm2, %v2428_v9  ;;  %3511 = vmatmul.mubr.msk.f32.vlgmr.msra.gmra.mrb[16].mxu0 %vm681_vm2, %v2428_v9 }
0x13f0   : > { %3642 = vmatpush3.bf16.msra.mxu1 %v4098_v55  ;;  %3499 = vmatprep.mubr.msk.f32.mxu1 %vm3856_vm1, %v3857_v14 }
0x13f1   : > { %3651 = vmatpush3.bf16.msra.mxu0 %v4067_v43  ;;  %3521 = vmatprep.mubr.msk.f32.mxu0 %vm3856_vm1, %v3857_v14  ;;  %v663_v43 = vadd.f32 %v4045_v20, %v4043_v19 }
0x13f2   : > { %3652 = vmatprep.subr.bf16.mxu0 %v3855_v8  ;;  %3658 = vmatprep.subr.bf16.mxu1 %v3855_v8 }
0x13f5   : > { %3654 = vmatpush3.bf16.msra.mxu0 %v4079_v47 }
0x13f6   : > { %v2503_v10 = vpop.permute.xlu1 %2502  ;;  %3655 = vmatprep.subr.bf16.mxu0 %v3855_v8 }
0x13f7   : > { %3500 = vmatmul.mubr.msk.f32.vlgmr.msra.gmra.mrb[18].mxu1 %vm866_vm3, %v2503_v10 }
0x13f8   : > { %3535 = vmatprep.mubr.msk.f32.mxu1 %vm3856_vm1, %v3857_v14 }
0x14c2   : > { %v2668_v11 = vpop.f32.mrb[16].mxu0 }
0x14c3   : > { %v2672_v12 = vadd.f32 %v2668_v11, %v663_v43  ;;  %v3512_v15 = vpop.f32.mrb[17].mxu0 }
0x14c5   : > { %v3158_v18 = vmul.f32 -1.442695, %v2672_v12 }
0x14c7   : > { %3792 = vpow2.f32 %v3158_v18 }
0x14ca   : > { %v2572_v21 = vpop.f32.mrb[18].mxu1 }
0x14cb   : > { %v3669_v23 = vadd.f32 %v4128_v63, %v2572_v21  ;;  %v3501_v47 = vpop.f32.mrb[19].mxu1 }
0x14cd   : > { %v3155_v24 = vmul.f32 -1.442695, %v3669_v23 }
0x14cf   : > { %3794 = vpow2.f32 %v3155_v24 }
0x14d1   : > { %v3793_v8 = vpop.eup %3792 }
0x14d2   : > { %v2676_v25 = vadd.f32 1.0, %v3793_v8 }
0x14d4   : > { %3796 = vrcp.f32 %v2676_v25 }
0x14d9   : > { %v3795_v26 = vpop.eup %3794 }
0x14da   : > { %v2580_v27 = vadd.f32 1.0, %v3795_v26 }
0x14dc   : > { %3798 = vrcp.f32 %v2580_v27 }
0x14de   : > { %v3797_v28 = vpop.eup %3796 }
0x14df   : > { %v2679_v29 = vmul.f32 2.0, %v3797_v28  ;;  %v2681_v35 = vmul.f32 %v3797_v28, %v2419_v62  ;;  %v2875_v62 = vld [vmem:[%s4398_s7 + $0x8] sm:$0xff] }
0x14e1   : > { %v3159_v19 = vadd.f32 -1.0, %v2679_v29 }
0x14e3   : > { %2683 = vrot.lane.b32.xlu0 %v3159_v19, %s3858_s15 }
0x14e6   : > { %v3799_v20 = vpop.eup %3798 }
0x14e7   : > { %v2583_v30 = vmul.f32 2.0, %v3799_v20  ;;  %v2585_v38 = vmul.f32 %v3799_v20, %v2323_v1 }
0x14e9   : > { %v3156_v17 = vadd.f32 -1.0, %v2583_v30 }
0x14eb   : > { %2587 = vrot.lane.b32.xlu1 %v3156_v17, %s3860_s24 }
0x1555   : > { %v2684_v31 = vpop.permute.xlu0 %2683 }
0x1556   : > { %v2686_v32 = vmul.f32 %v3797_v28, %v2684_v31 }
0x1558   : > { %2688 = vrot.lane.b32.xlu0 %v2686_v32, %s3859_s16 }
0x155d   : > { %v2588_v33 = vpop.permute.xlu1 %2587 }
0x155e   : > { %v2590_v34 = vmul.f32 %v3799_v20, %v2588_v33 }
0x1560   : > { %2592 = vrot.lane.b32.xlu1 %v2590_v34, %s3861_s14 }
0x15ca   : > { %v2689_v36 = vpop.permute.xlu0 %2688 }
0x15cb   : > { %v2691_v37 = vadd.f32 %v2689_v36, %v2681_v35 }
0x15cd   : > { %3800 = vtanh.f32 %v2691_v37 }
0x15d2   : > { %v2593_v39 = vpop.permute.xlu1 %2592 }
0x15d3   : > { %v2595_v40 = vadd.f32 %v2593_v39, %v2585_v38 }
0x15d5   : > { %3802 = vtanh.f32 %v2595_v40 }
0x15d7   : > { %v3801_v41 = vpop.eup %3800 }
0x15d8   : > { %2694 = vrot.lane.b32.xlu0 %v3801_v41, %s3858_s15 }
0x15df   : > { %v3803_v6 = vpop.eup %3802 }
0x15e0   : > { %2598 = vrot.lane.b32.xlu1 %v3803_v6, %s3859_s16 }
0x164a   : > { %v2695_v42 = vpop.permute.xlu0 %2694 }
0x164b   : > { %v2697_v44 = vmul.f32 %v3797_v28, %v2695_v42 }
0x164d   : > { %2699 = vrot.lane.b32.xlu0 %v2697_v44, %s3859_s16 }
0x1652   : > { %v2599_v45 = vpop.permute.xlu1 %2598 }
0x1653   : > { %v2601_v51 = vmul.f32 %v3799_v20, %v2599_v45 }
0x1655   : > { %2774 = vrot.lane.b32.xlu1 %v2601_v51, %s3862_s28 }
0x16bf   : > { %v2700_v13 = vpop.permute.xlu0 %2699 }
0x16c0   : > { %3522 = vmatmul.mubr.msk.f32.vlgmr.msra.gmra.mrb[18].mxu0 %vm681_vm2, %v2700_v13 }
0x16c1   : > { %3657 = vmatpush3.bf16.msra.mxu0 %v4098_v55  ;;  %3528 = vmatprep.mubr.msk.f32.mxu0 %vm3856_vm1, %v3857_v14 }
0x16c7   : > { %v2775_v46 = vpop.permute.xlu1 %2774 }
0x16c8   : > { %3529 = vmatmul.mubr.msk.f32.vlgmr.msra.gmra.mrb[18].mxu0 %vm866_vm3, %v2775_v46 }
0x179b   : > { %v2844_v48 = vpop.f32.mrb[18].mxu0 }
0x179c   : > { %v3670_v49 = vadd.f32 %v4128_v63, %v2844_v48  ;;  %v3530_v22 = vpop.f32.mrb[19].mxu0  ;;  %v2874_v63 = vld [vmem:[%s4398_s7] sm:$0xff] }
0x179d   : > { %v3659_v52 = vpack.c.bf16 %v2875_v62, %v2874_v63 }
0x179e   : > { %v3162_v50 = vmul.f32 -1.442695, %v3670_v49 }
0x179f   : > { %3660 = vmatpush3.bf16.msra.mxu1 %v3659_v52 }
0x17a0   : > { %3804 = vpow2.f32 %v3162_v50 }
0x17aa   : > { %v3805_v53 = vpop.eup %3804 }
0x17ab   : > { %v2852_v54 = vadd.f32 1.0, %v3805_v53 }
0x17ad   : > { %3806 = vrcp.f32 %v2852_v54 }
0x17b7   : > { %v3807_v56 = vpop.eup %3806 }
0x17b8   : > { %v2855_v57 = vmul.f32 2.0, %v3807_v56  ;;  %v2857_v14 = vmul.f32 %v3807_v56, %v2595_v40 }
0x17ba   : > { %v3163_v58 = vadd.f32 -1.0, %v2855_v57 }
0x17bc   : > { %2859 = vrot.lane.b32.xlu0 %v3163_v58, %s3860_s24 }
0x182e   : > { %v2860_v55 = vpop.permute.xlu0 %2859 }
0x182f   : > { %v2862_v59 = vmul.f32 %v3807_v56, %v2860_v55 }
0x1831   : > { %2864 = vrot.lane.b32.xlu1 %v2862_v59, %s3861_s14 }
0x18a3   : > { %v2865_v60 = vpop.permute.xlu1 %2864 }
0x18a4   : > { %v2867_v61 = vadd.f32 %v2865_v60, %v2857_v14 }
0x18a6   : > { %3808 = vtanh.f32 %v2867_v61 }
0x18b0   : > { %v3809_v0 = vpop.eup %3808 }
0x18b1   : > { %2870 = vrot.lane.b32.xlu0 %v3809_v0, %s3859_s16 }
0x1923   : > { %v2871_v1 = vpop.permute.xlu0 %2870 }
0x1924   : > { %v2873_v2 = vmul.f32 %v3807_v56, %v2871_v1 }
0x1926   : > { %2884 = vrot.lane.b32.xlu1 %v2873_v2, %s3862_s28 }
0x1998   : > { %v2885_v3 = vpop.permute.xlu1 %2884 }
0x1999   : > { %3536 = vmatmul.mubr.msk.f32.vlgmr.msra.gmra.mrb[20].mxu1 %vm866_vm3, %v2885_v3 }
0x1a6c   : > { %v2954_v5 = vpop.f32.mrb[20].mxu1 }
0x1a6d   : > { %v2955_v7 = vadd.f32 %v3164_v4, %v2954_v5  ;;  %v3537_v16 = vpop.f32.mrb[21].mxu1 }
0x1a6f   : > { %v2959_v9 = vsel %vm2958_vm4, %v2955_v7, -inf }
0x1a70   : > { %2960 = vmax.xlane.f32.xlu0 %v2959_v9 }
0x1afd   : > { %v2961_v10 = vpop.xlane.xlu0 %2960 }
0x1afe   : > { %v2962_v43 = vsub.f32 %v2955_v7, %v2961_v10 }
0x1b00   : > { %v2963_v11 = vmul.f32 1.442695, %v2962_v43 }
0x1b02   : > { %3810 = vpow2.f32 %v2963_v11 }
0x1b0c   : > { %v3811_v12 = vpop.eup %3810 }
0x1b0d   : > { %v2965_v15 = vsel %vm2958_vm4, %v3811_v12, 0.0 }
0x1b0e   : > { %2966 = vadd.xlane.f32.xlu1 %v2965_v15 }
0x1b9b   : > { %v2967_v18 = vpop.xlane.xlu1 %2966 }
0x1b9c   : > { %3812 = vrcp.f32 %v2967_v18 }
0x1ba6   : > { %v3813_v21 = vpop.eup %3812 }
0x1ba7   : > { %v2969_v23 = vmul.f32 %v3813_v21, %v3811_v12 }
0x1ba9   : > { %2970 = vst.msk [vmem:[%s519_s21] sm:$0xff] %vm2958_vm4, %v2969_v23 }
0x1baa PF: > { %s24_s25 = sadd.s32 1, %s3852_s25  }
0x1bab   : > { %p21_p2 = scmp.ge.s32.totalorder %s24_s25, 4  }
0x1bad   :  { %23 = sbr.rel (!%p21_p2) target bundleno = 1 (0x1), region = 119 }
0x1bb4   :  { %2990 = vsyncpa [#allocation3], 1 }
0x1bb5   :  { %2992 = vsyncpa [#allocation3 + $0x1], 1 }

</bundles_post_ra>
